<compile_context>
chip_gen: v7x
topology: tpu7x:2x2x1
jax: 0.10.0
libtpu: 0.0.40
codegen_flags: <defaults>
</compile_context>

<pallas_src>
import jax
import jax.numpy as jnp
from jax import lax
from jax.experimental import pallas as pl
from jax.experimental.pallas import tpu as pltpu


def _make_kernel(H, W, C, Cout):
    """Build the fused mixed-op kernel as a closure over the static dims."""
    WC = W * Cout          # merged output width (identity requires C == Cout)
    Mp = (W + 2) * C       # merged padded-input width

    def kernel(alpha_ref,   # SMEM (6,) f32          mixing weights (alphas)
               xp_ref,      # VMEM (Bt, H+2, Mp)     zero-padded, W/C merged
               mask_ref,    # VMEM (H+2, Mp)         0 interior, -inf border
               w_ref,       # VMEM (3*Mp, 2*WC)      banded conv3|sep weights
               b_ref,       # VMEM (1, 2*WC)         merged BN biases
               o_ref):      # VMEM (Bt, H, WC)
        xp = xp_ref[...]
        Bt = xp.shape[0]

        # Three vertically shifted row slabs, shared by pools and the matmul.
        r0 = xp[:, 0:H, :]
        r1 = xp[:, 1:H + 1, :]
        r2 = xp[:, 2:H + 2, :]

        # --- max_pool_3x3: PyTorch pads with -inf -> additive -inf border mask
        xneg = xp + mask_ref[...][None, :, :]
        n0 = xneg[:, 0:H, :]
        n1 = xneg[:, 1:H + 1, :]
        n2 = xneg[:, 2:H + 2, :]
        rowmax = jnp.maximum(jnp.maximum(n0, n1), n2)            # (Bt, H, Mp)
        mx = jnp.maximum(jnp.maximum(rowmax[:, :, 0:WC],
                                     rowmax[:, :, C:C + WC]),
                         rowmax[:, :, 2 * C:2 * C + WC])         # (Bt, H, WC)

        # --- avg_pool_3x3 (count_include_pad=True -> divisor is always 9)
        rowsum = r0 + r1 + r2
        av = (rowsum[:, :, 0:WC] + rowsum[:, :, C:C + WC]
              + rowsum[:, :, 2 * C:2 * C + WC])                  # (Bt, H, WC)

        # --- identity (interior of the padded, merged slab)
        ident = r1[:, :, C:C + WC]

        # --- conv_3x3 + sep_conv_3x3: ONE fused banded matmul on the MXU.
        A = jnp.concatenate([r0, r1, r2], axis=2).reshape(Bt * H, 3 * Mp)
        R = jnp.dot(A, w_ref[...], preferred_element_type=jnp.float32)
        R = jnp.maximum(R + b_ref[...], 0.0).reshape(Bt, H, 2 * WC)

        a0 = alpha_ref[0]
        a1_9 = alpha_ref[1] * (1.0 / 9.0)   # fold /9 into the mixing scalar
        a2 = alpha_ref[2]
        a3 = alpha_ref[3]
        a4 = alpha_ref[4]
        # alphas[5] is the 'none' branch -> exact zero contribution, dropped.
        out = (a0 * mx + a1_9 * av + a4 * ident
               + a2 * R[:, :, 0:WC] + a3 * R[:, :, WC:2 * WC])
        o_ref[...] = out.astype(o_ref.dtype)

    return kernel


def _banded_weight(wk, W, C, Cout):
    """wk: (3, 3, C, Cout) conv taps -> (3, (W+2)*C, W*Cout) banded blocks.

    Row index  = jin*C + ci    (merged padded-input column),
    Col index  = jout*Cout + co (merged output column),
    value      = wk[dh, jin - jout, ci, co] when 0 <= jin - jout <= 2, else 0.
    """
    jin = jnp.arange(W + 2)
    jout = jnp.arange(W)
    dw = jin[:, None] - jout[None, :]                        # (W+2, W)
    valid = (dw >= 0) & (dw <= 2)
    sel = wk[:, jnp.clip(dw, 0, 2)]                          # (3, W+2, W, C, Cout)
    sel = jnp.where(valid[None, :, :, None, None], sel, 0.0)
    return jnp.transpose(sel, (0, 1, 3, 2, 4)).reshape(3, (W + 2) * C, W * Cout)


def _pick_batch_tile(N, H, W, C, Cout):
    """Largest divisor of N that fits a small activation budget and still
    leaves >=2 grid steps (so both v7x TensorCores get work)."""
    per_img = ((H + 2) * (W + 2) * C + H * W * Cout) * 4
    budget = 2 << 20
    best = 1
    for bt in range(1, N + 1):
        if N % bt:
            continue
        if bt * per_img > budget:
            continue
        if N > 1 and (N // bt) < 2:
            continue
        best = bt
    return best


def mixed_operation(x_nchw, alphas, params, *, batch_tile=None):
    """Pallas implementation of MixedOperation.forward (reduction=False)."""
    N, C, H, W = x_nchw.shape
    Cout = params["w3_hwio"].shape[-1]
    assert C == Cout, "identity branch requires in_channels == out_channels"
    Mp = (W + 2) * C
    WC = W * Cout

    # NCHW -> NHWC, zero-pad H/W by 1, merge W and C onto the lane axis.
    x = jnp.transpose(x_nchw, (0, 2, 3, 1)).astype(jnp.float32)
    xp = jnp.pad(x, ((0, 0), (1, 1), (1, 1), (0, 0))).reshape(N, H + 2, Mp)

    # Grid-invariant additive -inf border mask (MaxPool2d pads with -inf).
    m2 = jnp.zeros((H + 2, W + 2), jnp.float32)
    m2 = (m2.at[0, :].set(-jnp.inf).at[-1, :].set(-jnp.inf)
            .at[:, 0].set(-jnp.inf).at[:, -1].set(-jnp.inf))
    neg_mask = jnp.broadcast_to(m2[:, :, None], (H + 2, W + 2, C)).reshape(H + 2, Mp)

    # Fold eval-mode BatchNorm into the conv weights / biases.
    eps = 1e-5
    scale1 = params["bn1_gamma"] / jnp.sqrt(params["bn1_var"] + eps)
    bias1 = params["bn1_beta"] - params["bn1_mean"] * scale1
    scale2 = params["bn2_gamma"] / jnp.sqrt(params["bn2_var"] + eps)
    bias2 = params["bn2_beta"] - params["bn2_mean"] * scale2

    w3_eff = params["w3_hwio"] * scale1                               # (3,3,C,Cout)
    wpw_eff = params["wpw_hwio"][0, 0] * scale2[None, :]              # (C,Cout)
    wsep_eff = (params["wdw_hwio"][:, :, 0, :, None]
                * wpw_eff[None, None, :, :])                          # (3,3,C,Cout)

    # One banded weight producing both conv_3x3 and sep_conv_3x3 pre-activations.
    wfused = jnp.concatenate([_banded_weight(w3_eff, W, C, Cout),
                              _banded_weight(wsep_eff, W, C, Cout)],
                             axis=2).reshape(3 * Mp, 2 * WC)
    bias_m = jnp.concatenate([jnp.tile(bias1, W),
                              jnp.tile(bias2, W)]).reshape(1, 2 * WC)

    if batch_tile is None:
        batch_tile = _pick_batch_tile(N, H, W, C, Cout)
    grid = (N // batch_tile,)

    out_m = pl.pallas_call(
        _make_kernel(H, W, C, Cout),
        out_shape=jax.ShapeDtypeStruct((N, H, WC), jnp.float32),
        grid=grid,
        in_specs=[
            pl.BlockSpec(memory_space=pltpu.MemorySpace.SMEM),           # alphas
            pl.BlockSpec((batch_tile, H + 2, Mp), lambda n: (n, 0, 0)),  # padded x
            pl.BlockSpec((H + 2, Mp), lambda n: (0, 0)),                 # -inf mask
            pl.BlockSpec((3 * Mp, 2 * WC), lambda n: (0, 0)),            # fused weights
            pl.BlockSpec((1, 2 * WC), lambda n: (0, 0)),                 # fused bias
        ],
        out_specs=pl.BlockSpec((batch_tile, H, WC), lambda n: (n, 0, 0)),
        compiler_params=pltpu.CompilerParams(
            dimension_semantics=("parallel",),
            vmem_limit_bytes=32 * 1024 * 1024),
    )(alphas.astype(jnp.float32), xp, neg_mask, wfused, bias_m)

    # merged (N, H, W*Cout) -> NCHW
    return jnp.transpose(out_m.reshape(N, H, W, Cout), (0, 3, 1, 2))


def reference(x_nchw, alphas, params):
    """Pure-JAX reference mirroring the PyTorch forward (eval-mode BN)."""
    x = jnp.transpose(x_nchw, (0, 2, 3, 1)).astype(jnp.float32)    # NHWC
    N, H, W, C = x.shape
    eps = 1e-5
    pad = ((0, 0), (1, 1), (1, 1), (0, 0))
    dn = ('NHWC', 'HWIO', 'NHWC')

    mx = lax.reduce_window(x, -jnp.inf, lax.max, (1, 3, 3, 1), (1, 1, 1, 1), pad)
    av = lax.reduce_window(x, 0.0, lax.add, (1, 3, 3, 1), (1, 1, 1, 1), pad) / 9.0

    def bn_relu(z, g, b, m, v):
        return jnp.maximum((z - m) / jnp.sqrt(v + eps) * g + b, 0.0)

    c3 = lax.conv_general_dilated(x, params["w3_hwio"], (1, 1), ((1, 1), (1, 1)),
                                  dimension_numbers=dn)
    c3 = bn_relu(c3, params["bn1_gamma"], params["bn1_beta"],
                 params["bn1_mean"], params["bn1_var"])

    dw = lax.conv_general_dilated(x, params["wdw_hwio"], (1, 1), ((1, 1), (1, 1)),
                                  dimension_numbers=dn, feature_group_count=C)
    pw = lax.conv_general_dilated(dw, params["wpw_hwio"], (1, 1), ((0, 0), (0, 0)),
                                  dimension_numbers=dn)
    sp = bn_relu(pw, params["bn2_gamma"], params["bn2_beta"],
                 params["bn2_mean"], params["bn2_var"])

    branches = [mx, av, c3, sp, x, jnp.zeros_like(x)]
    out = sum(a * b for a, b in zip(list(alphas), branches))
    return jnp.transpose(out, (0, 3, 1, 2))


if __name__ == "__main__":
    N, C, H, W = 2, 16, 16, 16     # in_channels == out_channels == 16 (default)
    key = jax.random.PRNGKey(0)
    keys = jax.random.split(key, 12)

    x = jax.random.normal(keys[0], (N, C, H, W), jnp.float32)
    alphas = jax.nn.softmax(jax.random.normal(keys[1], (6,), jnp.float32))

    params = {
        # conv_3x3 branch: Conv2d(C, C, 3, pad=1, bias=False) + BN + ReLU
        "w3_hwio": jax.random.normal(keys[2], (3, 3, C, C), jnp.float32) * 0.1,
        "bn1_gamma": jax.random.uniform(keys[3], (C,), jnp.float32, 0.5, 1.5),
        "bn1_beta": jax.random.normal(keys[4], (C,), jnp.float32) * 0.1,
        "bn1_mean": jax.random.normal(keys[5], (C,), jnp.float32) * 0.1,
        "bn1_var": jax.random.uniform(keys[6], (C,), jnp.float32, 0.5, 1.5),
        # sep_conv_3x3 branch: depthwise 3x3 + pointwise 1x1 + BN + ReLU
        "wdw_hwio": jax.random.normal(keys[7], (3, 3, 1, C), jnp.float32) * 0.1,
        "wpw_hwio": jax.random.normal(keys[8], (1, 1, C, C), jnp.float32) * 0.1,
        "bn2_gamma": jax.random.uniform(keys[9], (C,), jnp.float32, 0.5, 1.5),
        "bn2_beta": jax.random.normal(keys[10], (C,), jnp.float32) * 0.1,
        "bn2_mean": jnp.zeros((C,), jnp.float32),
        "bn2_var": jax.random.uniform(keys[11], (C,), jnp.float32, 0.5, 1.5),
    }

    out = mixed_operation(x, alphas, params)
    out = jax.block_until_ready(out)

    ref = reference(x, alphas, params)
    assert out.shape == (N, C, H, W)
    assert jnp.allclose(out, ref, atol=1e-4, rtol=1e-4), (
        float(jnp.max(jnp.abs(out - ref))))

    print("KERNEL_OK")
</pallas_src>

<mosaic_0001>
module attributes {stable_mosaic.version = 11 : i64} {
  func.func @kernel(%arg0: i32, %arg1: memref<6xf32, #tpu.memory_space<smem>>, %arg2: memref<1x18x288xf32, #tpu.memory_space<vmem>>, %arg3: memref<18x288xf32, #tpu.memory_space<vmem>>, %arg4: memref<864x512xf32, #tpu.memory_space<vmem>>, %arg5: memref<1x512xf32, #tpu.memory_space<vmem>>, %arg6: memref<1x16x256xf32, #tpu.memory_space<vmem>>) attributes {dimension_semantics = [#tpu.dimension_semantics<parallel>], iteration_bounds = array<i64: 2>, scalar_prefetch = 0 : i64, scratch_operands = 0 : i64, tpu.core_type = #tpu.core_type<tc>, window_params = [{transform_indices = @transform_0, window_bounds = array<i64: 6>}, {transform_indices = @transform_1, window_bounds = array<i64: 1, 18, 288>}, {pipeline_mode = #tpu.pipeline_mode<synchronous>, transform_indices = @transform_2, window_bounds = array<i64: 18, 288>}, {pipeline_mode = #tpu.pipeline_mode<synchronous>, transform_indices = @transform_3, window_bounds = array<i64: 864, 512>}, {pipeline_mode = #tpu.pipeline_mode<synchronous>, transform_indices = @transform_4, window_bounds = array<i64: 1, 512>}, {transform_indices = @transform_5, window_bounds = array<i64: 1, 16, 256>}]} {
    %c0 = arith.constant 0 : index
    %c0_0 = arith.constant 0 : index
    %c0_1 = arith.constant 0 : index
    %0 = vector.load %arg2[%c0, %c0_0, %c0_1] : memref<1x18x288xf32, #tpu.memory_space<vmem>>, vector<1x18x288xf32>
    %1 = vector.extract_strided_slice %0 {offsets = [0, 0, 0], sizes = [1, 16, 288], strides = [1, 1, 1]} : vector<1x18x288xf32> to vector<1x16x288xf32>
    %2 = vector.extract_strided_slice %0 {offsets = [0, 1, 0], sizes = [1, 16, 288], strides = [1, 1, 1]} : vector<1x18x288xf32> to vector<1x16x288xf32>
    %3 = vector.extract_strided_slice %0 {offsets = [0, 2, 0], sizes = [1, 16, 288], strides = [1, 1, 1]} : vector<1x18x288xf32> to vector<1x16x288xf32>
    %c0_2 = arith.constant 0 : index
    %c0_3 = arith.constant 0 : index
    %4 = vector.load %arg3[%c0_2, %c0_3] : memref<18x288xf32, #tpu.memory_space<vmem>>, vector<18x288xf32>
    %5 = vector.shape_cast %4 : vector<18x288xf32> to vector<1x18x288xf32>
    %6 = arith.addf %0, %5 : vector<1x18x288xf32>
    %7 = vector.extract_strided_slice %6 {offsets = [0, 0, 0], sizes = [1, 16, 288], strides = [1, 1, 1]} : vector<1x18x288xf32> to vector<1x16x288xf32>
    %8 = vector.extract_strided_slice %6 {offsets = [0, 1, 0], sizes = [1, 16, 288], strides = [1, 1, 1]} : vector<1x18x288xf32> to vector<1x16x288xf32>
    %9 = vector.extract_strided_slice %6 {offsets = [0, 2, 0], sizes = [1, 16, 288], strides = [1, 1, 1]} : vector<1x18x288xf32> to vector<1x16x288xf32>
    %10 = arith.maximumf %7, %8 : vector<1x16x288xf32>
    %11 = arith.maximumf %10, %9 : vector<1x16x288xf32>
    %12 = vector.extract_strided_slice %11 {offsets = [0, 0, 0], sizes = [1, 16, 256], strides = [1, 1, 1]} : vector<1x16x288xf32> to vector<1x16x256xf32>
    %13 = vector.extract_strided_slice %11 {offsets = [0, 0, 16], sizes = [1, 16, 256], strides = [1, 1, 1]} : vector<1x16x288xf32> to vector<1x16x256xf32>
    %14 = arith.maximumf %12, %13 : vector<1x16x256xf32>
    %15 = vector.extract_strided_slice %11 {offsets = [0, 0, 32], sizes = [1, 16, 256], strides = [1, 1, 1]} : vector<1x16x288xf32> to vector<1x16x256xf32>
    %16 = arith.maximumf %14, %15 : vector<1x16x256xf32>
    %17 = arith.addf %1, %2 : vector<1x16x288xf32>
    %18 = arith.addf %17, %3 : vector<1x16x288xf32>
    %19 = vector.extract_strided_slice %18 {offsets = [0, 0, 0], sizes = [1, 16, 256], strides = [1, 1, 1]} : vector<1x16x288xf32> to vector<1x16x256xf32>
    %20 = vector.extract_strided_slice %18 {offsets = [0, 0, 16], sizes = [1, 16, 256], strides = [1, 1, 1]} : vector<1x16x288xf32> to vector<1x16x256xf32>
    %21 = arith.addf %19, %20 : vector<1x16x256xf32>
    %22 = vector.extract_strided_slice %18 {offsets = [0, 0, 32], sizes = [1, 16, 256], strides = [1, 1, 1]} : vector<1x16x288xf32> to vector<1x16x256xf32>
    %23 = arith.addf %21, %22 : vector<1x16x256xf32>
    %24 = vector.extract_strided_slice %2 {offsets = [0, 0, 16], sizes = [1, 16, 256], strides = [1, 1, 1]} : vector<1x16x288xf32> to vector<1x16x256xf32>
    %25 = tpu.concatenate %1, %2, %3 in 2 : vector<1x16x288xf32>, vector<1x16x288xf32>, vector<1x16x288xf32> -> vector<1x16x864xf32>
    %26 = vector.shape_cast %25 : vector<1x16x864xf32> to vector<16x864xf32>
    %c0_4 = arith.constant 0 : index
    %c0_5 = arith.constant 0 : index
    %27 = vector.load %arg4[%c0_4, %c0_5] : memref<864x512xf32, #tpu.memory_space<vmem>>, vector<864x512xf32>
    %cst = arith.constant dense<0.000000e+00> : vector<16x512xf32>
    %28 = tpu.matmul %26, %27, %cst {dimension_numbers = #tpu.dot_dimension_numbers<[1], [0], [0], [1], [0, 0, 1, 1], [], []>} : vector<16x864xf32>, vector<864x512xf32>, vector<16x512xf32> -> vector<16x512xf32>
    %c0_6 = arith.constant 0 : index
    %c0_7 = arith.constant 0 : index
    %29 = vector.load %arg5[%c0_6, %c0_7] : memref<1x512xf32, #tpu.memory_space<vmem>>, vector<1x512xf32>
    %30 = vector.broadcast %29 : vector<1x512xf32> to vector<16x512xf32>
    %31 = arith.addf %28, %30 : vector<16x512xf32>
    %cst_8 = arith.constant 0.000000e+00 : f32
    %32 = vector.broadcast %cst_8 : f32 to vector<16x512xf32>
    %33 = arith.maximumf %31, %32 : vector<16x512xf32>
    %34 = vector.shape_cast %33 : vector<16x512xf32> to vector<1x16x512xf32>
    %c0_9 = arith.constant 0 : index
    %35 = memref.load %arg1[%c0_9] : memref<6xf32, #tpu.memory_space<smem>>
    %c1 = arith.constant 1 : index
    %36 = memref.load %arg1[%c1] : memref<6xf32, #tpu.memory_space<smem>>
    %cst_10 = arith.constant 0.111111112 : f32
    %37 = arith.mulf %36, %cst_10 : f32
    %c2 = arith.constant 2 : index
    %38 = memref.load %arg1[%c2] : memref<6xf32, #tpu.memory_space<smem>>
    %c3 = arith.constant 3 : index
    %39 = memref.load %arg1[%c3] : memref<6xf32, #tpu.memory_space<smem>>
    %c4 = arith.constant 4 : index
    %40 = memref.load %arg1[%c4] : memref<6xf32, #tpu.memory_space<smem>>
    %41 = vector.broadcast %35 : f32 to vector<1x16x256xf32>
    %42 = arith.mulf %41, %16 : vector<1x16x256xf32>
    %43 = vector.broadcast %37 : f32 to vector<1x16x256xf32>
    %44 = arith.mulf %43, %23 : vector<1x16x256xf32>
    %45 = arith.addf %42, %44 : vector<1x16x256xf32>
    %46 = vector.broadcast %40 : f32 to vector<1x16x256xf32>
    %47 = arith.mulf %46, %24 : vector<1x16x256xf32>
    %48 = arith.addf %45, %47 : vector<1x16x256xf32>
    %49 = vector.extract_strided_slice %34 {offsets = [0, 0, 0], sizes = [1, 16, 256], strides = [1, 1, 1]} : vector<1x16x512xf32> to vector<1x16x256xf32>
    %50 = vector.broadcast %38 : f32 to vector<1x16x256xf32>
    %51 = arith.mulf %50, %49 : vector<1x16x256xf32>
    %52 = arith.addf %48, %51 : vector<1x16x256xf32>
    %53 = vector.extract_strided_slice %34 {offsets = [0, 0, 256], sizes = [1, 16, 256], strides = [1, 1, 1]} : vector<1x16x512xf32> to vector<1x16x256xf32>
    %54 = vector.broadcast %39 : f32 to vector<1x16x256xf32>
    %55 = arith.mulf %54, %53 : vector<1x16x256xf32>
    %56 = arith.addf %52, %55 : vector<1x16x256xf32>
    %c0_11 = arith.constant 0 : index
    %c0_12 = arith.constant 0 : index
    %c0_13 = arith.constant 0 : index
    %57 = vector.load %arg6[%c0_11, %c0_12, %c0_13] : memref<1x16x256xf32, #tpu.memory_space<vmem>>, vector<1x16x256xf32>
    tpu.vector_store %arg6[%c0_11, %c0_12, %c0_13], %56 {strides = array<i32>} : memref<1x16x256xf32, #tpu.memory_space<vmem>>, vector<1x16x256xf32>,
    return
  }
  func.func @transform_0(%arg0: i32) -> i32 {
    %c0_i32 = arith.constant 0 : i32
    %c0_i32_0 = arith.constant 0 : i32
    return %c0_i32 : i32
  }
  func.func @transform_1(%arg0: i32) -> (i32, i32, i32) {
    %c0_i32 = arith.constant 0 : i32
    %c0_i32_0 = arith.constant 0 : i32
    %c0_i32_1 = arith.constant 0 : i32
    return %arg0, %c0_i32, %c0_i32_0 : i32, i32, i32
  }
  func.func @transform_2(%arg0: i32) -> (i32, i32) {
    %c0_i32 = arith.constant 0 : i32
    %c0_i32_0 = arith.constant 0 : i32
    %c0_i32_1 = arith.constant 0 : i32
    return %c0_i32, %c0_i32_0 : i32, i32
  }
  func.func @transform_3(%arg0: i32) -> (i32, i32) {
    %c0_i32 = arith.constant 0 : i32
    %c0_i32_0 = arith.constant 0 : i32
    %c0_i32_1 = arith.constant 0 : i32
    return %c0_i32, %c0_i32_0 : i32, i32
  }
  func.func @transform_4(%arg0: i32) -> (i32, i32) {
    %c0_i32 = arith.constant 0 : i32
    %c0_i32_0 = arith.constant 0 : i32
    %c0_i32_1 = arith.constant 0 : i32
    return %c0_i32, %c0_i32_0 : i32, i32
  }
  func.func @transform_5(%arg0: i32) -> (i32, i32, i32) {
    %c0_i32 = arith.constant 0 : i32
    %c0_i32_0 = arith.constant 0 : i32
    %c0_i32_1 = arith.constant 0 : i32
    return %arg0, %c0_i32, %c0_i32_0 : i32, i32, i32
  }
}

</mosaic_0001>

<bundles_post_ra>
// kernel: tpu_custom_call.1
= control target key start
LH: loop header
LB: loop body
LE: loop exit
PB: predicated region body
PF: predicated region fallthrough
CT: control target
= control target key end

     0   :  { %10 = vsyncpa [#allocation5], 0  ;;  %s3390_s0 = inlined_call_operand.hbm [shape: f32[6], index: 0, kind: input, shape index: {}]   ;;  %s3391_s1 = inlined_call_operand.vmem [shape: f32[2,18,288], index: 1, kind: input, shape index: {}]   ;;  %s3392_s2 = inlined_call_operand.hbm [shape: f32[18,288], index: 2, kind: input, shape index: {}]   ;;  %s3393_s3 = inlined_call_operand.hbm [shape: f32[864,512], index: 3, kind: input, shape index: {}]   ;;  %s3394_s4 = inlined_call_operand.hbm [shape: f32[1,512], index: 4, kind: input, shape index: {}]   ;;  %s3395_s5 = inlined_call_operand.hbm [shape: f32[2,16,256], index: 5, kind: output, shape index: {}]  }
   0x1   :  { %11 = vsyncpa [#allocation3], 0 }
   0x2   :  { %12 = vsyncpa [#allocation8], 0 }
   0x3   :  { %13 = vsyncpa [#allocation4], 0 }
   0x4   :  { %15 = vsyncpa [#allocation4 + $0x1], 0  ;;  %s2713_s18 = smov 0   ;;  %s2715_s19 = smov 0  }
   0x5   :  { %s2717_s20 = smov 0   ;;  %s2719_s21 = smov 0  }
   0x6 LB: > { %s2734_s22 = sadd.s32 4294967295, %s2665_s21   ;;  %s1891_s23 = sadd.s32 4294967294, %s2665_s21   ;;  %s2665_s21 = sphi %s2719_s21, %s3419_s21   ;;  %s2661_s20 = sphi %s2717_s20, %s3418_s20   ;;  %s2657_s19 = sphi %s2715_s19, %s3417_s19   ;;  %s2653_s18 = sphi %s2713_s18, %s3416_s18  }
   0x7   : > { %s2738_s24 = sadd.s32 1, %s2665_s21   ;;  %s138_s25 = sadd.s32 1, %s2661_s20 }
   0x8   : > { %s135_s26 = ssub.s32 %s2665_s21, %s2738_s24  ;;  %p148_p0 = scmp.ne.s32.totalorder %s2661_s20, %s2657_s19 }
   0x9   : > { %p136_p1 = scmp.eq.s32.totalorder %s135_s26, 0  ;;  %p149_p2 = scmp.eq.s32.totalorder %s2734_s22, 1 }
   0xa   : > { %p154_p3 = scmp.ne.s32.totalorder %s2657_s19, %s2653_s18  ;;  %p155_p4 = scmp.eq.s32.totalorder %s1891_s23, 1 }
   0xb   : > { %s2749_s27 = scalar_select %p136_p1, %s2661_s20, %s138_s25  }
   0xc   : > { %p2751_p5 = por %p149_p2, %p148_p0  ;;  %p2755_p6 = por %p155_p4, %p154_p3 }
   0xd   : > { %3399 = sst [smem:[#allocation15_spill]] %s2749_s27  ;;  %p1892_p7 = scmp.ge.s32.totalorder %s2665_s21, 1 }
   0xe   : > { %s3400_s28 = scalar_select %p2751_p5, 1, 0 }
   0xf   : > { %s3401_s29 = scalar_select %p2755_p6, 1, 0 }
  0x10   : > { %p162_p8 = scmp.lt.s32.totalorder %s2665_s21, 3  ;;  %p3396_p9 = scmp.eq.s32.totalorder %s2734_s22, 0 }
  0x11   : > { %s2667_s6 = smov [#allocation7]   ;;  %s2668_s9 = smov [#allocation6]  }
  0x12   : > { %p2762_p10 = pnand %p1892_p7, %p162_p8  ;;  %s196_s7 = sshll.u32 %s2667_s6, 4  ;;  %s197_s7 = int_to_ptr.vmem [resolvable:$true] %s196_s7 }
  0x13   : > { %s183_s10 = sshll.u32 %s2668_s9, 4  ;;  %s2494_s13 = scalar_lea.hbm %s3393_s3, 55296  ;;  %s2774_s10 = int_to_ptr.vmem [resolvable:$true] %s183_s10 }
  0x14   : > { %s3402_s30 = scalar_select %p2762_p10, 1, 0 }
  0x15   : > { %p2402_p11 = pneg %p2762_p10  ;;  %p2495_p13 = scmp.ne.s32.totalorder %s3393_s3, %s2494_s13 }
  0x16   : > { %p2501_p3 = scmp.lt.u32.totalorder %s2494_s13, %s3393_s3 }
  0x17   : > { %p2770_p12 = pnand %p3396_p9, %p2402_p11 }
  0x19   : > { %p2784_p0 = pneg %p2770_p12 }
  0x1b   : > { %p2497_p1 = pnand %p2784_p0, %p2495_p13 }
  0x1d   : > { %p2498_p2 = pneg %p2497_p1 }
  0x1f   : > { %p2503_p4 = pnand %p2501_p3, %p2498_p2 }
  0x21   : > { %2506 = shalt.err (!%p2503_p4)
}
  0x22   : > { %s2507_s25 = scalar_lea.vmem %s197_s7, 55296  ;;  %p2515_p9 = scmp.lt.s32.totalorder %s197_s7, %s197_s7 }
  0x23   : > { %p2508_p7 = scmp.ne.s32.totalorder %s197_s7, %s2507_s25  ;;  %p2516_p6 = scmp.lt.s32.totalorder %s2507_s25, %s2507_s25 }
  0x25   : > { %p2510_p8 = pnand %p2508_p7, %p2784_p0  ;;  %p2517_p5 = por %p2516_p6, %p2515_p9 }
  0x27   : > { %p2511_p11 = pneg %p2510_p8 }
  0x29   : > { %p2518_p10 = pnand %p2517_p5, %p2511_p11 }
  0x2b   : > { %2521 = shalt.err (!%p2518_p10)
}
  0x2c   : > { %s2669_s26 = smov 512   ;;  %s2670_s6 = smov 32  }
  0x2d   : > { %2411 = dma.hbm_to_vmem [thread:$0]  (!%p2770_p12), %s3393_s3, 55296, %s197_s7, [#allocation8], %s2669_s26, %s2669_s26, %s2670_s6  }
  0x2e   : > { %s2522_s14 = scalar_lea.hbm %s3390_s0, 16 }
  0x2f   : > { %p2523_p13 = scmp.ne.s32.totalorder %s3390_s0, %s2522_s14  ;;  %p2529_p9 = scmp.lt.u32.totalorder %s2522_s14, %s3390_s0 }
  0x31   : > { %p2525_p5 = pnand %p2523_p13, %p2784_p0 }
  0x33   : > { %p2526_p6 = pneg %p2525_p5 }
  0x35   : > { %p2531_p10 = pnand %p2529_p9, %p2526_p6 }
  0x37   : > { %2534 = shalt.err (!%p2531_p10)
}
  0x38   : > { %s2671_s27 = smov [#allocation2]   ;;  %s2535_s11 = scalar_lea.hbm %s3392_s2, 1152 }
  0x39   : > { %2405 = dma.hbm_to_smem (!%p2770_p12), %s3390_s0, 16, %s2671_s27, [#allocation5]  }
  0x3a   : > { %p2536_p1 = scmp.ne.s32.totalorder %s3392_s2, %s2535_s11  ;;  %p2542_p4 = scmp.lt.u32.totalorder %s2535_s11, %s3392_s2 }
  0x3c   : > { %p2538_p2 = pnand %p2536_p1, %p2784_p0 }
  0x3e   : > { %p2539_p3 = pneg %p2538_p2 }
  0x40   : > { %p2544_p7 = pnand %p2542_p4, %p2539_p3 }
  0x42   : > { %2547 = shalt.err (!%p2544_p7)
}
  0x43   : > { %s2548_s27 = scalar_lea.vmem %s2774_s10, 1152  ;;  %p2556_p5 = scmp.lt.s32.totalorder %s2774_s10, %s2774_s10 }
  0x44   : > { %p2549_p8 = scmp.ne.s32.totalorder %s2774_s10, %s2548_s27  ;;  %p2557_p6 = scmp.lt.s32.totalorder %s2548_s27, %s2548_s27 }
  0x46   : > { %p2551_p11 = pnand %p2549_p8, %p2784_p0  ;;  %p2558_p9 = por %p2557_p6, %p2556_p5 }
  0x48   : > { %p2552_p13 = pneg %p2551_p11 }
  0x4a   : > { %p2559_p10 = pnand %p2558_p9, %p2552_p13 }
  0x4c   : > { %2562 = shalt.err (!%p2559_p10)
}
  0x4d   : > { %s2672_s17 = smov 384   ;;  %s2673_s23 = smov 24  }
  0x4e   : > { %2408 = dma.hbm_to_vmem [thread:$0]  (!%p2770_p12), %s3392_s2, 1152, %s2774_s10, [#allocation3], %s2672_s17, %s2672_s17, %s2673_s23  }
  0x4f   : > { %s2674_s26 = smov [#allocation9]   ;;  %s2563_s12 = scalar_lea.hbm %s3394_s4, 64 }
  0x50   : > { %s210_s6 = sshll.u32 %s2674_s26, 4  ;;  %p2564_p1 = scmp.ne.s32.totalorder %s3394_s4, %s2563_s12  ;;  %s211_s6 = int_to_ptr.vmem [resolvable:$true] %s210_s6 }
  0x51   : > { %p2570_p4 = scmp.lt.u32.totalorder %s2563_s12, %s3394_s4 }
  0x52   : > { %p2566_p2 = pnand %p2564_p1, %p2784_p0 }
  0x54   : > { %p2567_p3 = pneg %p2566_p2 }
  0x56   : > { %p2572_p7 = pnand %p2570_p4, %p2567_p3 }
  0x58   : > { %2575 = shalt.err (!%p2572_p7)
}
  0x59   : > { %s2576_s10 = scalar_lea.vmem %s211_s6, 64  ;;  %p2584_p5 = scmp.lt.s32.totalorder %s211_s6, %s211_s6 }
  0x5a   : > { %p2577_p8 = scmp.ne.s32.totalorder %s211_s6, %s2576_s10  ;;  %p2585_p6 = scmp.lt.s32.totalorder %s2576_s10, %s2576_s10 }
  0x5c   : > { %p2579_p11 = pnand %p2577_p8, %p2784_p0  ;;  %p2586_p9 = por %p2585_p6, %p2584_p5 }
  0x5e   : > { %p2580_p13 = pneg %p2579_p11 }
  0x60   : > { %p2587_p10 = pnand %p2586_p9, %p2580_p13 }
  0x62   : > { %2590 = shalt.err (!%p2587_p10)
}
  0x63   : > { %2414 = dma.hbm_to_vmem [thread:$0]  (!%p2770_p12), %s3394_s4, 64, %s211_s6, [#allocation8]  }
  0x64   : > { %p3405_p1 = scmp.ne.s32.totalorder %s3402_s30, 0 }
  0x65   : > { %p3406_p2 = scmp.eq.s32.totalorder (!%p3405_p1), %s2734_s22, 0 }
  0x66   : > { %231 = sbr.rel (%p3405_p1) target bundleno = 583 (0x247), region = 40 }
  0x6d   : > { %2636 = dma.done.wait (%p3406_p2), [#allocation5], 16   ;;  %p3407_p0 = pmov %p3406_p2 }
  0x6f   : > { %2638 = vsyncadd (%p3407_p0), [#allocation5], 4294967280  ;;  %p3408_p3 = pmov %p3407_p0 }
  0x70   : > { %p3409_p4 = pmov %p3407_p0 }
  0x71   : > { %2640 = dma.done.wait (%p3408_p3), [#allocation3], 1152  }
  0x72   : > { %2642 = vsyncadd (%p3409_p4), [#allocation3], 4294966144  ;;  %p3410_p7 = pmov %p3407_p0 }
  0x73   : > { %p3411_p12 = pmov %p3407_p0 }
  0x74   : > { %2644 = dma.done.wait (%p3410_p7), [#allocation8], 55360  }
  0x75   : > { %2646 = vsyncadd (%p3411_p12), [#allocation8], 4294911936 }
  0x76   : > { %249 = sfence }
  0x77   : > { %v591_v0 = vld [vmem:[#allocation7 + $0x8] sm:$0xff]  ;;  %v593_v2 = vld [vmem:[#allocation7 + $0x18] sm:$0xff]  ;;  %p272_p8 = scmp.lt.s32.totalorder %s2734_s22, 1  ;;  %v590_v5 = vld [vmem:[#allocation7] sm:$0xff]  ;;  %vm313_vm0 = vcmask 1046528   ;;  %vm341_vm1 = vcmask 1045504  }
  0x78   : > { %v595_v1 = vld [vmem:[#allocation7 + $0x28] sm:$0xff]  ;;  %v597_v4 = vld [vmem:[#allocation7 + $0x38] sm:$0xff]  ;;  %v594_v6 = vld [vmem:[#allocation7 + $0x20] sm:$0xff]  ;;  %s2675_s26 = smov 32   ;;  %s2676_s6 = smov 64   ;;  %vm554_vm2 = vcmask 261120  }
  0x79   : > { %v1919_v3 = vpack.c.bf16 %v595_v1, %v591_v0  ;;  %v2135_v7 = vpack.c.bf16 %v597_v4, %v593_v2  ;;  %v1921_v8 = vpack.c.bf16 %v594_v6, %v590_v5  ;;  %v592_v9 = vld [vmem:[#allocation7 + $0x10] sm:$0xff]  ;;  %v599_v11 = vld [vmem:[#allocation7 + $0x48] sm:$0xff]  ;;  %s273_s30 = scalar_select %p272_p8, %s2734_s22, 1  ;;  %v601_v14 = vld [vmem:[#allocation7 + $0x58] sm:$0xff]  ;;  %vm577_vm3 = vcmask 523264  }
  0x7a   : > { %v596_v10 = vld [vmem:[#allocation7 + $0x30] sm:$0xff]  ;;  %v603_v13 = vld [vmem:[#allocation7 + $0x68] sm:$0xff]  ;;  %v605_v15 = vld [vmem:[#allocation7 + $0x78] sm:$0xff]  ;;  %s2677_s9 = smov 112   ;;  %s2678_s11 = smov 96   ;;  %vm412_vm4 = vcmask 785408  }
  0x7b   : > { %1920 = vmatprep.subr.bf16.mxu0 %v1919_v3  ;;  %v2137_v12 = vpack.c.bf16 %v596_v10, %v592_v9  ;;  %2136 = vmatprep.subr.bf16.mxu1 %v2135_v7  ;;  %v1923_v16 = vpack.c.bf16 %v603_v13, %v599_v11  ;;  %v2139_v17 = vpack.c.bf16 %v605_v15, %v601_v14  ;;  %v598_v18 = vld [vmem:[#allocation7 + $0x40] sm:$0xff]  ;;  %v600_v20 = vld [vmem:[#allocation7 + $0x50] sm:$0xff]  ;;  %s2383_s8 = smul.u32 72, %s273_s30  ;;  %v607_v23 = vld [vmem:[#allocation7 + $0x88] sm:$0xff]  ;;  %s3210_s12 = sld [smem:[#allocation2 + $0x4]]  ;;  %vm387_vm5 = vcmask 916480  }
  0x7c   : > { %1922 = vmatpush1.bf16.msra.mxu0 %v1921_v8  ;;  %v602_v19 = vld [vmem:[#allocation7 + $0x60] sm:$0xff]  ;;  %v604_v22 = vld [vmem:[#allocation7 + $0x70] sm:$0xff]  ;;  %v611_v24 = vld [vmem:[#allocation7 + $0xa8] sm:$0xff]  ;;  %s3299_s13 = sld [smem:[#allocation2 + $0x1]]  ;;  %s1672_s14 = sld [smem:[#allocation2]] }
  0x7d   : > { %2138 = vmatpush1.bf16.msra.mxu1 %v2137_v12  ;;  %v1925_v21 = vpack.c.bf16 %v602_v19, %v598_v18  ;;  %1924 = vmatprep.subr.bf16.mxu0 %v1923_v16  ;;  %v2141_v25 = vpack.c.bf16 %v604_v22, %v600_v20  ;;  %v1927_v26 = vpack.c.bf16 %v611_v24, %v607_v23  ;;  %v609_v27 = vld [vmem:[#allocation7 + $0x98] sm:$0xff]  ;;  %v606_v29 = vld [vmem:[#allocation7 + $0x80] sm:$0xff]  ;;  %s2876_s7 = scalar_lea.vmem %s3391_s1, %s2383_s8  ;;  %v608_v32 = vld [vmem:[#allocation7 + $0x90] sm:$0xff]  ;;  %s3326_s27 = sld [smem:[#allocation2 + $0x2]] }
  0x7e   : > { %2140 = vmatprep.subr.bf16.mxu1 %v2139_v17  ;;  %v613_v28 = vld [vmem:[#allocation7 + $0xb8] sm:$0xff]  ;;  %v610_v31 = vld [vmem:[#allocation7 + $0xa0] sm:$0xff]  ;;  %v612_v33 = vld [vmem:[#allocation7 + $0xb0] sm:$0xff]  ;;  %s3328_s10 = sld [smem:[#allocation2 + $0x3]]  ;;  %s269_s17 = sand.u32 1, %s2657_s19  }
  0x7f   : > { %v2143_v30 = vpack.c.bf16 %v613_v28, %v609_v27  ;;  %v1929_v34 = vpack.c.bf16 %v610_v31, %v606_v29  ;;  %v2879_v35 = vld [vmem:[%s2876_s7 + $0x10] sm:$0xff]  ;;  %v2882_v36 = vld [vmem:[%s2876_s7 + $0x28] sm:$0xff]  ;;  %v2885_v37 = vld [vmem:[%s2876_s7] sm:$0xff]  ;;  %v2145_v38 = vpack.c.bf16 %v612_v33, %v608_v32  ;;  %s1903_s23 = sshll.u32 %s269_s17, 5  ;;  %s1918_s16 = sshll.u32 %s2734_s22, 9 }
  0x80   : > { %1926 = vmatpush1.bf16.msra.mxu0 %v1925_v21  ;;  %v440_v39 = vrot.slane %v2879_v35, 1  ;;  %v441_v40 = vrot.slane %v2882_v36, 1  ;;  %v278_v41 = vld [vmem:[%s2876_s7 + $0x8] sm:$0xff]  ;;  %v2891_v42 = vld [vmem:[%s2876_s7 + $0x18] sm:$0xff]  ;;  %v2894_v43 = vld [vmem:[%s2876_s7 + $0x20] sm:$0xff]  ;;  %v434_v44 = vrot.slane %v2885_v37, 1 }
  0x81   : > { %2142 = vmatpush1.bf16.msra.mxu1 %v2141_v25  ;;  %1928 = vmatprep.subr.bf16.mxu0 %v1927_v26  ;;  %v435_v45 = vrot.slane %v2891_v42, 1  ;;  %v437_v46 = vrot.slane %v278_v41, 1  ;;  %v438_v47 = vrot.slane %v2894_v43, 1  ;;  %v615_v48 = vld [vmem:[#allocation7 + $0xc8] sm:$0xff]  ;;  %v617_v50 = vld [vmem:[#allocation7 + $0xd8] sm:$0xff]  ;;  %v614_v54 = vld [vmem:[#allocation7 + $0xc0] sm:$0xff] }
  0x82   : > { %2144 = vmatprep.subr.bf16.mxu1 %v2143_v30  ;;  %v619_v49 = vld [vmem:[#allocation7 + $0xe8] sm:$0xff]  ;;  %1112 = vmatprep.mubr.f32.mxu0 %v278_v41  ;;  %v442_v51 = vsel %vm313_vm0, %v440_v39, %v441_v40  ;;  %v621_v53 = vld [vmem:[#allocation7 + $0xf8] sm:$0xff]  ;;  %v618_v55 = vld [vmem:[#allocation7 + $0xe0] sm:$0xff]  ;;  %v461_v56 = vrot.slane %v2885_v37, 2  ;;  %v462_v57 = vrot.slane %v2891_v42, 2  ;;  %v464_v63 = vrot.slane %v278_v41, 2 }
  0x83   : > { %v1931_v52 = vpack.c.bf16 %v619_v49, %v615_v48  ;;  %1420 = vmatprep.mubr.f32.mxu1 %v278_v41  ;;  %546 = vrot.lane.b32.xlu1 %v442_v51, %s2675_s26  ;;  %v436_v58 = vsel %vm313_vm0, %v434_v44, %v435_v45  ;;  %v439_v59 = vsel %vm313_vm0, %v437_v46, %v438_v47  ;;  %v616_v60 = vld [vmem:[#allocation7 + $0xd0] sm:$0xff]  ;;  %v623_v62 = vld [vmem:[#allocation7 + $0x108] sm:$0xff]  ;;  %v625_v4 = vld [vmem:[#allocation7 + $0x118] sm:$0xff]  ;;  %v465_v6 = vrot.slane %v2894_v43, 2  ;;  %s1674_s15 = smul.f32 0.11111111, %s3299_s13 }
  0x84   : > { %1930 = vmatpush1.bf16.msra.mxu0 %v1929_v34  ;;  %v620_v61 = vld [vmem:[#allocation7 + $0xf0] sm:$0xff]  ;;  %v456_v0 = vadd.f32 %v439_v59, %v278_v41  ;;  %v2475_v1 = vpack.i.bf16 %v439_v59, %v436_v58  ;;  %v455_v2 = vadd.f32 %v436_v58, %v2885_v37  ;;  %v627_v3 = vld [vmem:[#allocation7 + $0x128] sm:$0xff]  ;;  %v629_v5 = vld [vmem:[#allocation7 + $0x138] sm:$0xff]  ;;  %v2147_v7 = vpack.c.bf16 %v621_v53, %v617_v50  ;;  %s271_s30 = scalar_lea.vmem [#allocation10], %s1903_s23  ;;  %s3349_s22 = scalar_lea.sflag [#allocation4], %s269_s17 }
  0x85   : > { %2146 = vmatpush1.bf16.msra.mxu1 %v2145_v38  ;;  %1932 = vmatprep.subr.bf16.mxu0 %v1931_v52  ;;  %v1933_v8 = vpack.c.bf16 %v618_v55, %v614_v54  ;;  %v2149_v9 = vpack.c.bf16 %v620_v61, %v616_v60  ;;  %v463_v10 = vsel %vm341_vm1, %v461_v56, %v462_v57  ;;  %v622_v11 = vld [vmem:[#allocation7 + $0x100] sm:$0xff]  ;;  %v624_v13 = vld [vmem:[#allocation7 + $0x110] sm:$0xff]  ;;  %v631_v18 = vld [vmem:[#allocation7 + $0x148] sm:$0xff]  ;;  %v467_v25 = vrot.slane %v2879_v35, 2  ;;  %s1786_s8 = sshll.u32 %s271_s30, 4  ;;  %p3413_p13 = scmp.ne.s32.totalorder %s3400_s28, 0  ;;  %s3345_s8 = int_to_ptr.vmem [resolvable:$true] %s1786_s8 }
  0x86   : > { %v626_v12 = vld [vmem:[#allocation7 + $0x120] sm:$0xff]  ;;  %2476 = vrot.lane.b32.xlu0 %v2475_v1, %s2675_s26  ;;  %v2917_v14 = vadd.f32 %v463_v10, %v455_v2  ;;  %v1935_v15 = vpack.c.bf16 %v627_v3, %v623_v62  ;;  %v2151_v16 = vpack.c.bf16 %v629_v5, %v625_v4  ;;  %v628_v17 = vld [vmem:[#allocation7 + $0x130] sm:$0xff]  ;;  %v635_v19 = vld [vmem:[#allocation7 + $0x168] sm:$0xff]  ;;  %v457_v20 = vadd.f32 %v442_v51, %v2879_v35 }
  0x87   : > { %2148 = vmatprep.subr.bf16.mxu1 %v2147_v7  ;;  %v1937_v21 = vpack.c.bf16 %v626_v12, %v622_v11  ;;  %v633_v22 = vld [vmem:[#allocation7 + $0x158] sm:$0xff]  ;;  %v2923_v24 = vsel %vm341_vm1, %v464_v63, %v465_v6  ;;  %565 = vrot.lane.b32.xlu1 %v463_v10, %s2676_s6  ;;  %v2153_v26 = vpack.c.bf16 %v628_v17, %v624_v13  ;;  %v630_v28 = vld [vmem:[#allocation7 + $0x140] sm:$0xff]  ;;  %v632_v30 = vld [vmem:[#allocation7 + $0x150] sm:$0xff]  ;;  %v468_v32 = vrot.slane %v2882_v36, 2 }
  0x88   : > { %1934 = vmatpush1.bf16.msra.mxu0 %v1933_v8  ;;  %v637_v23 = vld [vmem:[#allocation7 + $0x178] sm:$0xff]  ;;  %v1939_v27 = vpack.c.bf16 %v635_v19, %v631_v18  ;;  %v634_v29 = vld [vmem:[#allocation7 + $0x160] sm:$0xff]  ;;  %v2928_v31 = vadd.f32 %v2923_v24, %v456_v0  ;;  %v636_v34 = vld [vmem:[#allocation7 + $0x170] sm:$0xff] }
  0x89   : > { %2150 = vmatpush1.bf16.msra.mxu1 %v2149_v9  ;;  %1936 = vmatprep.subr.bf16.mxu0 %v1935_v15  ;;  %v2155_v33 = vpack.c.bf16 %v637_v23, %v633_v22  ;;  %v639_v38 = vld [vmem:[#allocation7 + $0x188] sm:$0xff]  ;;  %v641_v39 = vld [vmem:[#allocation7 + $0x198] sm:$0xff]  ;;  %v2934_v44 = vsel %vm341_vm1, %v467_v25, %v468_v32  ;;  %v1941_v46 = vpack.c.bf16 %v634_v29, %v630_v28  ;;  %v638_v51 = vld [vmem:[#allocation7 + $0x180] sm:$0xff] }
  0x8a   : > { %2152 = vmatprep.subr.bf16.mxu1 %v2151_v16  ;;  %v643_v35 = vld [vmem:[#allocation7 + $0x1a8] sm:$0xff]  ;;  %v645_v41 = vld [vmem:[#allocation7 + $0x1b8] sm:$0xff]  ;;  %v2937_v48 = vadd.f32 %v2934_v44, %v457_v20  ;;  %v2157_v49 = vpack.c.bf16 %v636_v34, %v632_v30  ;;  %v642_v52 = vld [vmem:[#allocation7 + $0x1a0] sm:$0xff] }
  0x8b   : > { %v1943_v50 = vpack.c.bf16 %v643_v35, %v639_v38  ;;  %v640_v53 = vld [vmem:[#allocation7 + $0x190] sm:$0xff]  ;;  %v2159_v54 = vpack.c.bf16 %v645_v41, %v641_v39  ;;  %v647_v56 = vld [vmem:[#allocation7 + $0x1c8] sm:$0xff]  ;;  %v649_v59 = vld [vmem:[#allocation7 + $0x1d8] sm:$0xff]  ;;  %v1945_v61 = vpack.c.bf16 %v642_v52, %v638_v51 }
  0x8c   : > { %1938 = vmatpush1.bf16.msra.mxu0 %v1937_v21  ;;  %v644_v55 = vld [vmem:[#allocation7 + $0x1b0] sm:$0xff]  ;;  %v651_v58 = vld [vmem:[#allocation7 + $0x1e8] sm:$0xff]  ;;  %v653_v60 = vld [vmem:[#allocation7 + $0x1f8] sm:$0xff] }
  0x8d   : > { %2154 = vmatpush1.bf16.msra.mxu1 %v2153_v26  ;;  %1940 = vmatprep.subr.bf16.mxu0 %v1939_v27  ;;  %v2161_v62 = vpack.c.bf16 %v644_v55, %v640_v53  ;;  %v1947_v63 = vpack.c.bf16 %v651_v58, %v647_v56  ;;  %v646_v0 = vld [vmem:[#allocation7 + $0x1c0] sm:$0xff]  ;;  %v648_v2 = vld [vmem:[#allocation7 + $0x1d0] sm:$0xff]  ;;  %v2163_v3 = vpack.c.bf16 %v653_v60, %v649_v59  ;;  %v655_v5 = vld [vmem:[#allocation7 + $0x208] sm:$0xff] }
  0x8e   : > { %2156 = vmatprep.subr.bf16.mxu1 %v2155_v33  ;;  %v650_v1 = vld [vmem:[#allocation7 + $0x1e0] sm:$0xff]  ;;  %v652_v4 = vld [vmem:[#allocation7 + $0x1f0] sm:$0xff]  ;;  %v659_v7 = vld [vmem:[#allocation7 + $0x228] sm:$0xff] }
  0x8f   : > { %v657_v8 = vld [vmem:[#allocation7 + $0x218] sm:$0xff]  ;;  %v1949_v10 = vpack.c.bf16 %v650_v1, %v646_v0  ;;  %v2165_v11 = vpack.c.bf16 %v652_v4, %v648_v2  ;;  %v1951_v12 = vpack.c.bf16 %v659_v7, %v655_v5  ;;  %v654_v13 = vld [vmem:[#allocation7 + $0x200] sm:$0xff]  ;;  %v656_v16 = vld [vmem:[#allocation7 + $0x210] sm:$0xff] }
  0x90   : > { %1942 = vmatpush1.bf16.msra.mxu0 %v1941_v46  ;;  %v661_v9 = vld [vmem:[#allocation7 + $0x238] sm:$0xff]  ;;  %v658_v15 = vld [vmem:[#allocation7 + $0x220] sm:$0xff]  ;;  %v660_v18 = vld [vmem:[#allocation7 + $0x230] sm:$0xff] }
  0x91   : > { %2158 = vmatpush1.bf16.msra.mxu1 %v2157_v49  ;;  %1944 = vmatprep.subr.bf16.mxu0 %v1943_v50  ;;  %v2167_v17 = vpack.c.bf16 %v661_v9, %v657_v8  ;;  %v663_v19 = vld [vmem:[#allocation7 + $0x248] sm:$0xff]  ;;  %v665_v21 = vld [vmem:[#allocation7 + $0x258] sm:$0xff]  ;;  %v1953_v23 = vpack.c.bf16 %v658_v15, %v654_v13  ;;  %v2169_v25 = vpack.c.bf16 %v660_v18, %v656_v16  ;;  %v662_v27 = vld [vmem:[#allocation7 + $0x240] sm:$0xff] }
  0x92   : > { %2160 = vmatprep.subr.bf16.mxu1 %v2159_v54  ;;  %v667_v20 = vld [vmem:[#allocation7 + $0x268] sm:$0xff]  ;;  %v669_v22 = vld [vmem:[#allocation7 + $0x278] sm:$0xff]  ;;  %v666_v28 = vld [vmem:[#allocation7 + $0x260] sm:$0xff] }
  0x93   : > { %v1955_v26 = vpack.c.bf16 %v667_v20, %v663_v19  ;;  %v664_v29 = vld [vmem:[#allocation7 + $0x250] sm:$0xff]  ;;  %v2171_v30 = vpack.c.bf16 %v669_v22, %v665_v21  ;;  %v671_v34 = vld [vmem:[#allocation7 + $0x288] sm:$0xff]  ;;  %v673_v35 = vld [vmem:[#allocation7 + $0x298] sm:$0xff]  ;;  %v1957_v41 = vpack.c.bf16 %v666_v28, %v662_v27 }
  0x94   : > { %1946 = vmatpush1.bf16.msra.mxu0 %v1945_v61  ;;  %v668_v33 = vld [vmem:[#allocation7 + $0x270] sm:$0xff]  ;;  %v675_v38 = vld [vmem:[#allocation7 + $0x2a8] sm:$0xff]  ;;  %v677_v39 = vld [vmem:[#allocation7 + $0x2b8] sm:$0xff] }
  0x95   : > { %2162 = vmatpush1.bf16.msra.mxu1 %v2161_v62  ;;  %1948 = vmatprep.subr.bf16.mxu0 %v1947_v63  ;;  %v2173_v46 = vpack.c.bf16 %v668_v33, %v664_v29  ;;  %v1959_v49 = vpack.c.bf16 %v675_v38, %v671_v34  ;;  %v670_v50 = vld [vmem:[#allocation7 + $0x280] sm:$0xff]  ;;  %v672_v52 = vld [vmem:[#allocation7 + $0x290] sm:$0xff]  ;;  %v2175_v53 = vpack.c.bf16 %v677_v39, %v673_v35  ;;  %v679_v55 = vld [vmem:[#allocation7 + $0x2c8] sm:$0xff] }
  0x96   : > { %2164 = vmatprep.subr.bf16.mxu1 %v2163_v3  ;;  %v674_v51 = vld [vmem:[#allocation7 + $0x2a0] sm:$0xff]  ;;  %v676_v54 = vld [vmem:[#allocation7 + $0x2b0] sm:$0xff]  ;;  %v683_v56 = vld [vmem:[#allocation7 + $0x2e8] sm:$0xff] }
  0x97   : > { %v681_v58 = vld [vmem:[#allocation7 + $0x2d8] sm:$0xff]  ;;  %v1961_v60 = vpack.c.bf16 %v674_v51, %v670_v50  ;;  %v2177_v61 = vpack.c.bf16 %v676_v54, %v672_v52  ;;  %v1963_v62 = vpack.c.bf16 %v683_v56, %v679_v55  ;;  %v678_v63 = vld [vmem:[#allocation7 + $0x2c0] sm:$0xff]  ;;  %v680_v1 = vld [vmem:[#allocation7 + $0x2d0] sm:$0xff] }
  0x98   : > { %1950 = vmatpush1.bf16.msra.mxu0 %v1949_v10  ;;  %v685_v59 = vld [vmem:[#allocation7 + $0x2f8] sm:$0xff]  ;;  %v682_v0 = vld [vmem:[#allocation7 + $0x2e0] sm:$0xff]  ;;  %v684_v3 = vld [vmem:[#allocation7 + $0x2f0] sm:$0xff] }
  0x99   : > { %2166 = vmatpush1.bf16.msra.mxu1 %v2165_v11  ;;  %1952 = vmatprep.subr.bf16.mxu0 %v1951_v12  ;;  %v2179_v2 = vpack.c.bf16 %v685_v59, %v681_v58  ;;  %v687_v4 = vld [vmem:[#allocation7 + $0x308] sm:$0xff]  ;;  %v689_v7 = vld [vmem:[#allocation7 + $0x318] sm:$0xff]  ;;  %v1965_v9 = vpack.c.bf16 %v682_v0, %v678_v63  ;;  %v686_v10 = vld [vmem:[#allocation7 + $0x300] sm:$0xff]  ;;  %v2181_v12 = vpack.c.bf16 %v684_v3, %v680_v1 }
  0x9a   : > { %2168 = vmatprep.subr.bf16.mxu1 %v2167_v17  ;;  %v691_v5 = vld [vmem:[#allocation7 + $0x328] sm:$0xff]  ;;  %v693_v8 = vld [vmem:[#allocation7 + $0x338] sm:$0xff]  ;;  %v690_v11 = vld [vmem:[#allocation7 + $0x320] sm:$0xff] }
  0x9b   : > { %v1967_v13 = vpack.c.bf16 %v691_v5, %v687_v4  ;;  %v688_v15 = vld [vmem:[#allocation7 + $0x310] sm:$0xff]  ;;  %v695_v17 = vld [vmem:[#allocation7 + $0x348] sm:$0xff]  ;;  %v2183_v18 = vpack.c.bf16 %v693_v8, %v689_v7  ;;  %v697_v22 = vld [vmem:[#allocation7 + $0x358] sm:$0xff]  ;;  %v1969_v28 = vpack.c.bf16 %v690_v11, %v686_v10 }
  0x9c   : > { %1954 = vmatpush1.bf16.msra.mxu0 %v1953_v23  ;;  %v692_v16 = vld [vmem:[#allocation7 + $0x330] sm:$0xff]  ;;  %v699_v19 = vld [vmem:[#allocation7 + $0x368] sm:$0xff]  ;;  %v701_v23 = vld [vmem:[#allocation7 + $0x378] sm:$0xff] }
  0x9d   : > { %2170 = vmatpush1.bf16.msra.mxu1 %v2169_v25  ;;  %1956 = vmatprep.subr.bf16.mxu0 %v1955_v26  ;;  %v2940_v20 = vld [vmem:[%s2876_s7 + $0x30] sm:$0x3]  ;;  %v284_v21 = vld [vmem:[%s2876_s7 + $0x38] sm:$0x3]  ;;  %v2185_v29 = vpack.c.bf16 %v692_v16, %v688_v15  ;;  %v698_v33 = vld [vmem:[#allocation7 + $0x360] sm:$0xff]  ;;  %v1971_v38 = vpack.c.bf16 %v699_v19, %v695_v17 }
  0x9e   : > { %2172 = vmatprep.subr.bf16.mxu1 %v2171_v30  ;;  %v443_v25 = vrot.slane %v2940_v20, 1  ;;  %v445_v26 = vrot.slane %v284_v21, 1  ;;  %v470_v27 = vrot.slane %v2940_v20, 2  ;;  %v694_v30 = vld [vmem:[#allocation7 + $0x340] sm:$0xff]  ;;  %v472_v34 = vrot.slane %v284_v21, 2  ;;  %v696_v35 = vld [vmem:[#allocation7 + $0x350] sm:$0xff] }
  0x9f   : > { %v700_v39 = vld [vmem:[#allocation7 + $0x370] sm:$0xff]  ;;  %v703_v50 = vld [vmem:[#allocation7 + $0x388] sm:$0xff]  ;;  %v1973_v54 = vpack.c.bf16 %v698_v33, %v694_v30  ;;  %v705_v55 = vld [vmem:[#allocation7 + $0x398] sm:$0xff] }
  0xa0   : > { %1958 = vmatpush1.bf16.msra.mxu0 %v1957_v41  ;;  %v444_v41 = vsel %vm313_vm0, %v435_v45, %v443_v25  ;;  %v707_v51 = vld [vmem:[#allocation7 + $0x3a8] sm:$0xff]  ;;  %v709_v56 = vld [vmem:[#allocation7 + $0x3b8] sm:$0xff]  ;;  %v471_v58 = vsel %vm341_vm1, %v462_v57, %v470_v27  ;;  %v2189_v59 = vpack.c.bf16 %v700_v39, %v696_v35  ;;  %v702_v63 = vld [vmem:[#allocation7 + $0x380] sm:$0xff] }
  0xa1   : > { %2174 = vmatpush1.bf16.msra.mxu1 %v2173_v46  ;;  %1960 = vmatprep.subr.bf16.mxu0 %v1959_v49  ;;  %v446_v46 = vsel %vm313_vm0, %v438_v47, %v445_v26  ;;  %v2187_v49 = vpack.c.bf16 %v701_v23, %v697_v22  ;;  %v2958_v47 = vld [vmem:[%s2876_s7 + $0x40] sm:$0x3]  ;;  %v706_v0 = vld [vmem:[#allocation7 + $0x3a0] sm:$0xff]  ;;  %v704_v57 = vld [vmem:[#allocation7 + $0x390] sm:$0xff]  ;;  %v2191_v4 = vpack.c.bf16 %v709_v56, %v705_v55 }
  0xa2   : > { %2176 = vmatprep.subr.bf16.mxu1 %v2175_v53  ;;  %v2480_v52 = vpack.i.bf16 %v446_v46, %v444_v41  ;;  %v458_v53 = vadd.f32 %v444_v41, %v2891_v42  ;;  %v459_v45 = vadd.f32 %v446_v46, %v2894_v43  ;;  %v447_v1 = vrot.slane %v2958_v47, 1  ;;  %v708_v5 = vld [vmem:[#allocation7 + $0x3b0] sm:$0xff]  ;;  %v711_v7 = vld [vmem:[#allocation7 + $0x3c8] sm:$0xff]  ;;  %v717_v10 = vld [vmem:[#allocation7 + $0x3f8] sm:$0xff] }
  0xa3   : > { %v474_v3 = vrot.slane %v2958_v47, 2  ;;  %v715_v8 = vld [vmem:[#allocation7 + $0x3e8] sm:$0xff]  ;;  %v1977_v11 = vpack.c.bf16 %v706_v0, %v702_v63  ;;  %v710_v16 = vld [vmem:[#allocation7 + $0x3c0] sm:$0xff]  ;;  %v716_v21 = vld [vmem:[#allocation7 + $0x3f0] sm:$0xff] }
  0xa4   : > { %1962 = vmatpush1.bf16.msra.mxu0 %v1961_v60  ;;  %2481 = vrot.lane.b32.xlu0 %v2480_v52, %s2675_s26  ;;  %v2960_v60 = vadd.f32 %v471_v58, %v458_v53  ;;  %v1979_v15 = vpack.c.bf16 %v715_v8, %v711_v7  ;;  %v714_v17 = vld [vmem:[#allocation7 + $0x3e0] sm:$0xff]  ;;  %v719_v22 = vld [vmem:[#allocation7 + $0x408] sm:$0xff]  ;;  %v721_v25 = vld [vmem:[#allocation7 + $0x418] sm:$0xff] }
  0xa5   : > { %2178 = vmatpush1.bf16.msra.mxu1 %v2177_v61  ;;  %1964 = vmatprep.subr.bf16.mxu0 %v1963_v62  ;;  %v473_v61 = vsel %vm341_vm1, %v465_v6, %v472_v34  ;;  %v1975_v62 = vpack.c.bf16 %v707_v51, %v703_v50  ;;  %v448_v6 = vsel %vm313_vm0, %v441_v40, %v447_v1  ;;  %v723_v23 = vld [vmem:[#allocation7 + $0x428] sm:$0xff]  ;;  %v725_v26 = vld [vmem:[#allocation7 + $0x438] sm:$0xff]  ;;  %v720_v30 = vld [vmem:[#allocation7 + $0x410] sm:$0xff] }
  0xa6   : > { %2180 = vmatprep.subr.bf16.mxu1 %v2179_v2  ;;  %v2966_v2 = vadd.f32 %v473_v61, %v459_v45  ;;  %v475_v19 = vsel %vm341_vm1, %v468_v32, %v474_v3  ;;  %552 = vrot.lane.b32.xlu1 %v448_v6, %s2675_s26  ;;  %v1981_v27 = vpack.c.bf16 %v714_v17, %v710_v16  ;;  %v718_v32 = vld [vmem:[#allocation7 + $0x400] sm:$0xff]  ;;  %v724_v34 = vld [vmem:[#allocation7 + $0x430] sm:$0xff]  ;;  %v731_v35 = vld [vmem:[#allocation7 + $0x468] sm:$0xff]  ;;  %s3343_s26 = scalar_lea.hbm %s3395_s5, %s1918_s16 }
  0xa7   : > { %v2199_v33 = vpack.c.bf16 %v725_v26, %v721_v25  ;;  %v729_v39 = vld [vmem:[#allocation7 + $0x458] sm:$0xff]  ;;  %v726_v51 = vld [vmem:[#allocation7 + $0x440] sm:$0xff]  ;;  %v728_v53 = vld [vmem:[#allocation7 + $0x450] sm:$0xff] }
  0xa8   : > { %1966 = vmatpush1.bf16.msra.mxu0 %v1965_v9  ;;  %v713_v9 = vld [vmem:[#allocation7 + $0x3d8] sm:$0xff]  ;;  %567 = vrot.lane.b32.xlu0 %v2923_v24, %s2676_s6  ;;  %v730_v52 = vld [vmem:[#allocation7 + $0x460] sm:$0xff]  ;;  %v732_v55 = vld [vmem:[#allocation7 + $0x470] sm:$0xff] }
  0xa9   : > { %2182 = vmatpush1.bf16.msra.mxu1 %v2181_v12  ;;  %1968 = vmatprep.subr.bf16.mxu0 %v1967_v13  ;;  %v460_v12 = vadd.f32 %v448_v6, %v2882_v36  ;;  %v2193_v13 = vpack.c.bf16 %v708_v5, %v704_v57  ;;  %v2195_v40 = vpack.c.bf16 %v717_v10, %v713_v9  ;;  %v733_v41 = vld [vmem:[#allocation7 + $0x478] sm:$0xff]  ;;  %v735_v56 = vld [vmem:[#allocation7 + $0x488] sm:$0xff]  ;;  %v734_v63 = vld [vmem:[#allocation7 + $0x480] sm:$0xff] }
  0xaa   : > { %2184 = vmatprep.subr.bf16.mxu1 %v2183_v18  ;;  %v712_v18 = vld [vmem:[#allocation7 + $0x3d0] sm:$0xff]  ;;  %573 = vrot.lane.b32.xlu1 %v473_v61, %s2676_s6  ;;  %v737_v45 = vld [vmem:[#allocation7 + $0x498] sm:$0xff]  ;;  %v2205_v61 = vpack.c.bf16 %v732_v55, %v728_v53  ;;  %v738_v0 = vld [vmem:[#allocation7 + $0x4a0] sm:$0xff] }
  0xab   : > { %v2979_v24 = vadd.f32 %v475_v19, %v460_v12  ;;  %v2197_v36 = vpack.c.bf16 %v716_v21, %v712_v18  ;;  %v736_v57 = vld [vmem:[#allocation7 + $0x490] sm:$0xff]  ;;  %v747_v5 = vld [vmem:[#allocation7 + $0x4e8] sm:$0xff]  ;;  %v745_v7 = vld [vmem:[#allocation7 + $0x4d8] sm:$0xff] }
  0xac   : > { %1970 = vmatpush1.bf16.msra.mxu0 %v1969_v28  ;;  %571 = vrot.lane.b32.xlu0 %v471_v58, %s2676_s6  ;;  %v1983_v28 = vpack.c.bf16 %v723_v23, %v719_v22  ;;  %v739_v58 = vld [vmem:[#allocation7 + $0x4a8] sm:$0xff]  ;;  %v740_v3 = vld [vmem:[#allocation7 + $0x4b0] sm:$0xff]  ;;  %v749_v8 = vld [vmem:[#allocation7 + $0x4f8] sm:$0xff] }
  0xad   : > { %2186 = vmatpush1.bf16.msra.mxu1 %v2185_v29  ;;  %1972 = vmatprep.subr.bf16.mxu0 %v1971_v38  ;;  %v722_v29 = vld [vmem:[#allocation7 + $0x420] sm:$0xff]  ;;  %v727_v38 = vld [vmem:[#allocation7 + $0x448] sm:$0xff]  ;;  %v2209_v9 = vpack.c.bf16 %v740_v3, %v736_v57  ;;  %v744_v12 = vld [vmem:[#allocation7 + $0x4d0] sm:$0xff] }
  0xae   : > { %2188 = vmatprep.subr.bf16.mxu1 %v2187_v49  ;;  %v1985_v46 = vpack.c.bf16 %v722_v29, %v718_v32  ;;  %v2201_v49 = vpack.c.bf16 %v724_v34, %v720_v30  ;;  %v1987_v50 = vpack.c.bf16 %v731_v35, %v727_v38  ;;  %575 = vrot.lane.b32.xlu1 %v475_v19, %s2676_s6  ;;  %v742_v6 = vld [vmem:[#allocation7 + $0x4c0] sm:$0xff]  ;;  %v751_v16 = vld [vmem:[#allocation7 + $0x508] sm:$0xff]  ;;  %v753_v18 = vld [vmem:[#allocation7 + $0x518] sm:$0xff] }
  0xaf   : > { %v755_v17 = vld [vmem:[#allocation7 + $0x528] sm:$0xff]  ;;  %v750_v21 = vld [vmem:[#allocation7 + $0x500] sm:$0xff]  ;;  %v752_v23 = vld [vmem:[#allocation7 + $0x510] sm:$0xff] }
  0xb0   : > { %1974 = vmatpush1.bf16.msra.mxu0 %v1973_v54  ;;  %569 = vrot.lane.b32.xlu0 %v2934_v44, %s2676_s6  ;;  %v2203_v54 = vpack.c.bf16 %v733_v41, %v729_v39  ;;  %v1989_v44 = vpack.c.bf16 %v730_v52, %v726_v51  ;;  %v754_v22 = vld [vmem:[#allocation7 + $0x520] sm:$0xff]  ;;  %v756_v26 = vld [vmem:[#allocation7 + $0x530] sm:$0xff]  ;;  %v765_v32 = vld [vmem:[#allocation7 + $0x578] sm:$0xff]  ;;  %s2591_s6 = scalar_lea.vmem %s3345_s8, 512 }
  0xb1   : > { %2190 = vmatpush1.bf16.msra.mxu1 %v2189_v59  ;;  %1976 = vmatprep.subr.bf16.mxu0 %v1975_v62  ;;  %v741_v59 = vld [vmem:[#allocation7 + $0x4b8] sm:$0xff]  ;;  %v1991_v62 = vpack.c.bf16 %v739_v58, %v735_v56  ;;  %v2001_v29 = vpack.c.bf16 %v754_v22, %v750_v21  ;;  %v2217_v30 = vpack.c.bf16 %v756_v26, %v752_v23  ;;  %v758_v34 = vld [vmem:[#allocation7 + $0x540] sm:$0xff]  ;;  %v760_v35 = vld [vmem:[#allocation7 + $0x550] sm:$0xff]  ;;  %p2592_p11 = scmp.ne.s32.totalorder %s3345_s8, %s2591_s6 }
  0xb2   : > { %2192 = vmatprep.subr.bf16.mxu1 %v2191_v4  ;;  %v2207_v1 = vpack.c.bf16 %v741_v59, %v737_v45  ;;  %v743_v4 = vld [vmem:[#allocation7 + $0x4c8] sm:$0xff]  ;;  %v762_v38 = vld [vmem:[#allocation7 + $0x560] sm:$0xff]  ;;  %v764_v41 = vld [vmem:[#allocation7 + $0x570] sm:$0xff] }
  0xb3   : > { %v1995_v10 = vpack.c.bf16 %v747_v5, %v743_v4  ;;  %v773_v51 = vld [vmem:[#allocation7 + $0x5b8] sm:$0xff]  ;;  %v2005_v52 = vpack.c.bf16 %v762_v38, %v758_v34  ;;  %v2221_v53 = vpack.c.bf16 %v764_v41, %v760_v35  ;;  %v766_v55 = vld [vmem:[#allocation7 + $0x580] sm:$0xff]  ;;  %v768_v58 = vld [vmem:[#allocation7 + $0x590] sm:$0xff]  ;;  %p2593_p5 = pnand %p2592_p11, %p3413_p13 }
  0xb4   : > { %1978 = vmatpush1.bf16.msra.mxu0 %v1977_v11  ;;  %v746_v11 = vld [vmem:[#allocation7 + $0x4e0] sm:$0xff]  ;;  %v772_v59 = vld [vmem:[#allocation7 + $0x5b0] sm:$0xff]  ;;  %v797_v21 = vld [vmem:[#allocation7 + $0x678] sm:$0xff] }
  0xb5   : > { %2194 = vmatpush1.bf16.msra.mxu1 %v2193_v13  ;;  %1980 = vmatprep.subr.bf16.mxu0 %v1979_v15  ;;  %v2211_v13 = vpack.c.bf16 %v749_v8, %v745_v7  ;;  %v748_v15 = vld [vmem:[#allocation7 + $0x4f0] sm:$0xff]  ;;  %v1997_v19 = vpack.c.bf16 %v746_v11, %v742_v6  ;;  %v770_v56 = vld [vmem:[#allocation7 + $0x5a0] sm:$0xff]  ;;  %v2225_v57 = vpack.c.bf16 %v772_v59, %v768_v58  ;;  %v789_v6 = vld [vmem:[#allocation7 + $0x638] sm:$0xff]  ;;  %p2594_p6 = pneg %p2593_p5 }
  0xb6   : > { %2196 = vmatprep.subr.bf16.mxu1 %v2195_v40  ;;  %v2213_v40 = vpack.c.bf16 %v748_v15, %v744_v12  ;;  %v774_v3 = vld [vmem:[#allocation7 + $0x5c0] sm:$0xff]  ;;  %v776_v5 = vld [vmem:[#allocation7 + $0x5d0] sm:$0xff]  ;;  %v805_v34 = vld [vmem:[#allocation7 + $0x6b8] sm:$0xff] }
  0xb7   : > { %v778_v4 = vld [vmem:[#allocation7 + $0x5e0] sm:$0xff]  ;;  %v780_v8 = vld [vmem:[#allocation7 + $0x5f0] sm:$0xff] }
  0xb8   : > { %1982 = vmatpush1.bf16.msra.mxu0 %v1981_v27  ;;  %v759_v27 = vld [vmem:[#allocation7 + $0x548] sm:$0xff]  ;;  %v2013_v11 = vpack.c.bf16 %v778_v4, %v774_v3  ;;  %v2229_v12 = vpack.c.bf16 %v780_v8, %v776_v5  ;;  %v782_v15 = vld [vmem:[#allocation7 + $0x600] sm:$0xff]  ;;  %v821_v3 = vld [vmem:[#allocation7 + $0x738] sm:$0xff] }
  0xb9   : > { %2198 = vmatpush1.bf16.msra.mxu1 %v2197_v36  ;;  %1984 = vmatprep.subr.bf16.mxu0 %v1983_v28  ;;  %v763_v36 = vld [vmem:[#allocation7 + $0x568] sm:$0xff]  ;;  %v761_v28 = vld [vmem:[#allocation7 + $0x558] sm:$0xff]  ;;  %v790_v26 = vld [vmem:[#allocation7 + $0x640] sm:$0xff] }
  0xba   : > { %2200 = vmatprep.subr.bf16.mxu1 %v2199_v33  ;;  %v2003_v33 = vpack.c.bf16 %v763_v36, %v759_v27  ;;  %v2219_v39 = vpack.c.bf16 %v765_v32, %v761_v28  ;;  %v794_v27 = vld [vmem:[#allocation7 + $0x660] sm:$0xff]  ;;  %v792_v36 = vld [vmem:[#allocation7 + $0x650] sm:$0xff] }
  0xbb   : > { %1113 = vmatmul.mubr.f32.vlgmr.msra.gmra.mrb[0].mxu0 %v2885_v37  ;;  %v796_v32 = vld [vmem:[#allocation7 + $0x670] sm:$0xff]  ;;  %v2021_v38 = vpack.c.bf16 %v794_v27, %v790_v26  ;;  %v798_v41 = vld [vmem:[#allocation7 + $0x680] sm:$0xff]  ;;  %v837_v26 = vld [vmem:[#allocation7 + $0x7b8] sm:$0xff] }
  0xbc   : > { %1986 = vmatpush1.bf16.msra.mxu0 %v1985_v46  ;;  %1421 = vmatmul.mubr.f32.vlgmr.msra.gmra.mrb[0].mxu1 %v2885_v37  ;;  %v1993_v37 = vpack.c.bf16 %v738_v0, %v734_v63  ;;  %v767_v46 = vld [vmem:[#allocation7 + $0x588] sm:$0xff]  ;;  %v781_v63 = vld [vmem:[#allocation7 + $0x5f8] sm:$0xff]  ;;  %v2009_v0 = vpack.c.bf16 %v770_v56, %v766_v55  ;;  %v2237_v35 = vpack.c.bf16 %v796_v32, %v792_v36  ;;  %v806_v59 = vld [vmem:[#allocation7 + $0x6c0] sm:$0xff] }
  0xbd   : > { %2202 = vmatpush1.bf16.msra.mxu1 %v2201_v49  ;;  %1988 = vmatprep.subr.bf16.mxu0 %v1987_v50  ;;  %v771_v49 = vld [vmem:[#allocation7 + $0x5a8] sm:$0xff]  ;;  %v769_v50 = vld [vmem:[#allocation7 + $0x598] sm:$0xff]  ;;  %v814_v8 = vld [vmem:[#allocation7 + $0x700] sm:$0xff] }
  0xbe   : > { %2204 = vmatprep.subr.bf16.mxu1 %v2203_v54  ;;  %1118 = vmatprep.mubr.f32.mxu0 %v2894_v43  ;;  %v2007_v54 = vpack.c.bf16 %v771_v49, %v767_v46  ;;  %v2223_v45 = vpack.c.bf16 %v773_v51, %v769_v50  ;;  %v802_v46 = vld [vmem:[#allocation7 + $0x6a0] sm:$0xff]  ;;  %v800_v49 = vld [vmem:[#allocation7 + $0x690] sm:$0xff]  ;;  %v813_v55 = vld [vmem:[#allocation7 + $0x6f8] sm:$0xff] }
  0xbf   : > { %1426 = vmatprep.mubr.f32.mxu1 %v2894_v43  ;;  %1119 = vmatmul.mubr.f32.gmra.mrb[2].mxu0 %v2891_v42  ;;  %v757_v43 = vld [vmem:[#allocation7 + $0x538] sm:$0xff]  ;;  %v804_v51 = vld [vmem:[#allocation7 + $0x6b0] sm:$0xff]  ;;  %v2025_v56 = vpack.c.bf16 %v802_v46, %v798_v41  ;;  %v830_v32 = vld [vmem:[#allocation7 + $0x780] sm:$0xff] }
  0xc0   : > { %1990 = vmatpush1.bf16.msra.mxu0 %v1989_v44  ;;  %1427 = vmatmul.mubr.f32.gmra.mrb[2].mxu1 %v2891_v42  ;;  %v1999_v42 = vpack.c.bf16 %v755_v17, %v751_v16  ;;  %v2215_v25 = vpack.c.bf16 %v757_v43, %v753_v18  ;;  %v775_v44 = vld [vmem:[#allocation7 + $0x5c8] sm:$0xff]  ;;  %v786_v16 = vld [vmem:[#allocation7 + $0x620] sm:$0xff]  ;;  %v784_v17 = vld [vmem:[#allocation7 + $0x610] sm:$0xff]  ;;  %v2241_v58 = vpack.c.bf16 %v804_v51, %v800_v49 }
  0xc1   : > { %2206 = vmatpush1.bf16.msra.mxu1 %v2205_v61  ;;  %1992 = vmatprep.subr.bf16.mxu0 %v1991_v62  ;;  %v779_v61 = vld [vmem:[#allocation7 + $0x5e8] sm:$0xff]  ;;  %v777_v62 = vld [vmem:[#allocation7 + $0x5d8] sm:$0xff]  ;;  %v788_v43 = vld [vmem:[#allocation7 + $0x630] sm:$0xff]  ;;  %v2017_v22 = vpack.c.bf16 %v786_v16, %v782_v15 }
  0xc2   : > { %2208 = vmatprep.subr.bf16.mxu1 %v2207_v1  ;;  %v2011_v1 = vpack.c.bf16 %v779_v61, %v775_v44  ;;  %v2227_v7 = vpack.c.bf16 %v781_v63, %v777_v62  ;;  %v2233_v23 = vpack.c.bf16 %v788_v43, %v784_v17  ;;  %v810_v44 = vld [vmem:[#allocation7 + $0x6e0] sm:$0xff]  ;;  %v808_v61 = vld [vmem:[#allocation7 + $0x6d0] sm:$0xff]  ;;  %v829_v15 = vld [vmem:[#allocation7 + $0x778] sm:$0xff] }
  0xc3   : > { %v812_v63 = vld [vmem:[#allocation7 + $0x6f0] sm:$0xff]  ;;  %v2029_v4 = vpack.c.bf16 %v810_v44, %v806_v59  ;;  %v822_v43 = vld [vmem:[#allocation7 + $0x740] sm:$0xff]  ;;  %v845_v41 = vld [vmem:[#allocation7 + $0x7f8] sm:$0xff] }
  0xc4   : > { %1994 = vmatpush1.bf16.msra.mxu0 %v1993_v37  ;;  %v783_v37 = vld [vmem:[#allocation7 + $0x608] sm:$0xff]  ;;  %v2245_v5 = vpack.c.bf16 %v812_v63, %v808_v61  ;;  %v838_v51 = vld [vmem:[#allocation7 + $0x7c0] sm:$0xff]  ;;  %v853_v59 = vld [vmem:[#allocation7 + $0x838] sm:$0xff] }
  0xc5   : > { %2210 = vmatpush1.bf16.msra.mxu1 %v2209_v9  ;;  %1996 = vmatprep.subr.bf16.mxu0 %v1995_v10  ;;  %v787_v9 = vld [vmem:[#allocation7 + $0x628] sm:$0xff]  ;;  %v785_v10 = vld [vmem:[#allocation7 + $0x618] sm:$0xff] }
  0xc6   : > { %2212 = vmatprep.subr.bf16.mxu1 %v2211_v13  ;;  %v2015_v13 = vpack.c.bf16 %v787_v9, %v783_v37  ;;  %v2231_v18 = vpack.c.bf16 %v789_v6, %v785_v10  ;;  %v818_v37 = vld [vmem:[#allocation7 + $0x720] sm:$0xff]  ;;  %v816_v9 = vld [vmem:[#allocation7 + $0x710] sm:$0xff] }
  0xc7   : > { %v820_v6 = vld [vmem:[#allocation7 + $0x730] sm:$0xff]  ;;  %v2033_v16 = vpack.c.bf16 %v818_v37, %v814_v8  ;;  %v857_v8 = vld [vmem:[#allocation7 + $0x858] sm:$0xff] }
  0xc8   : > { %1998 = vmatpush1.bf16.msra.mxu0 %v1997_v19  ;;  %v791_v19 = vld [vmem:[#allocation7 + $0x648] sm:$0xff]  ;;  %v2249_v17 = vpack.c.bf16 %v820_v6, %v816_v9  ;;  %v861_v37 = vld [vmem:[#allocation7 + $0x878] sm:$0xff] }
  0xc9   : > { %2214 = vmatpush1.bf16.msra.mxu1 %v2213_v40  ;;  %2000 = vmatprep.subr.bf16.mxu0 %v1999_v42  ;;  %v795_v40 = vld [vmem:[#allocation7 + $0x668] sm:$0xff]  ;;  %v793_v42 = vld [vmem:[#allocation7 + $0x658] sm:$0xff] }
  0xca   : > { %2216 = vmatprep.subr.bf16.mxu1 %v2215_v25  ;;  %v2019_v25 = vpack.c.bf16 %v795_v40, %v791_v19  ;;  %v2235_v28 = vpack.c.bf16 %v797_v21, %v793_v42  ;;  %v826_v19 = vld [vmem:[#allocation7 + $0x760] sm:$0xff]  ;;  %v824_v40 = vld [vmem:[#allocation7 + $0x750] sm:$0xff] }
  0xcb   : > { %v828_v21 = vld [vmem:[#allocation7 + $0x770] sm:$0xff]  ;;  %v2037_v27 = vpack.c.bf16 %v826_v19, %v822_v43  ;;  %v2997_v43 = vld [vmem:[%s2876_s7 + $0x10] sm:$0xff] }
  0xcc   : > { %2002 = vmatpush1.bf16.msra.mxu0 %v2001_v29  ;;  %v799_v29 = vld [vmem:[#allocation7 + $0x688] sm:$0xff]  ;;  %v2253_v36 = vpack.c.bf16 %v828_v21, %v824_v40  ;;  %v2267_v40 = vpack.c.bf16 %v861_v37, %v857_v8  ;;  %v860_v21 = vld [vmem:[#allocation7 + $0x870] sm:$0xff] }
  0xcd   : > { %2218 = vmatpush1.bf16.msra.mxu1 %v2217_v30  ;;  %2004 = vmatprep.subr.bf16.mxu0 %v2003_v33  ;;  %v803_v30 = vld [vmem:[#allocation7 + $0x6a8] sm:$0xff]  ;;  %v801_v33 = vld [vmem:[#allocation7 + $0x698] sm:$0xff]  ;;  %v3023_v8 = vld [vmem:[#allocation7 + $0x970] sm:$0xff] }
  0xce   : > { %2220 = vmatprep.subr.bf16.mxu1 %v2219_v39  ;;  %v2023_v39 = vpack.c.bf16 %v803_v30, %v799_v29  ;;  %v2239_v50 = vpack.c.bf16 %v805_v34, %v801_v33  ;;  %v834_v29 = vld [vmem:[#allocation7 + $0x7a0] sm:$0xff]  ;;  %v832_v30 = vld [vmem:[#allocation7 + $0x790] sm:$0xff]  ;;  %v3025_v37 = vld [vmem:[#allocation7 + $0x988] sm:$0xff] }
  0xcf   : > { %v836_v34 = vld [vmem:[#allocation7 + $0x7b0] sm:$0xff]  ;;  %v2041_v46 = vpack.c.bf16 %v834_v29, %v830_v32  ;;  %v866_v32 = vld [vmem:[#allocation7 + $0x8a0] sm:$0xff] }
  0xd0   : > { %2006 = vmatpush1.bf16.msra.mxu0 %v2005_v52  ;;  %v807_v52 = vld [vmem:[#allocation7 + $0x6c8] sm:$0xff]  ;;  %v2257_v49 = vpack.c.bf16 %v836_v34, %v832_v30  ;;  %v868_v34 = vld [vmem:[#allocation7 + $0x8b0] sm:$0xff] }
  0xd1   : > { %2222 = vmatpush1.bf16.msra.mxu1 %v2221_v53  ;;  %2008 = vmatprep.subr.bf16.mxu0 %v2007_v54  ;;  %v811_v53 = vld [vmem:[#allocation7 + $0x6e8] sm:$0xff]  ;;  %v809_v54 = vld [vmem:[#allocation7 + $0x6d8] sm:$0xff] }
  0xd2   : > { %2224 = vmatprep.subr.bf16.mxu1 %v2223_v45  ;;  %v2027_v45 = vpack.c.bf16 %v811_v53, %v807_v52  ;;  %v2243_v62 = vpack.c.bf16 %v813_v55, %v809_v54  ;;  %v842_v52 = vld [vmem:[#allocation7 + $0x7e0] sm:$0xff]  ;;  %v840_v53 = vld [vmem:[#allocation7 + $0x7d0] sm:$0xff] }
  0xd3   : > { %v844_v55 = vld [vmem:[#allocation7 + $0x7f0] sm:$0xff]  ;;  %v2045_v44 = vpack.c.bf16 %v842_v52, %v838_v51 }
  0xd4   : > { %2010 = vmatpush1.bf16.msra.mxu0 %v2009_v0  ;;  %v815_v0 = vld [vmem:[#allocation7 + $0x708] sm:$0xff]  ;;  %v2261_v61 = vpack.c.bf16 %v844_v55, %v840_v53  ;;  %v876_v51 = vld [vmem:[#allocation7 + $0x8f0] sm:$0xff] }
  0xd5   : > { %2226 = vmatpush1.bf16.msra.mxu1 %v2225_v57  ;;  %2012 = vmatprep.subr.bf16.mxu0 %v2011_v1  ;;  %v819_v57 = vld [vmem:[#allocation7 + $0x728] sm:$0xff]  ;;  %v817_v1 = vld [vmem:[#allocation7 + $0x718] sm:$0xff] }
  0xd6   : > { %2228 = vmatprep.subr.bf16.mxu1 %v2227_v7  ;;  %v2031_v7 = vpack.c.bf16 %v819_v57, %v815_v0  ;;  %v2247_v10 = vpack.c.bf16 %v821_v3, %v817_v1  ;;  %v846_v0 = vld [vmem:[#allocation7 + $0x800] sm:$0xff]  ;;  %v848_v1 = vld [vmem:[#allocation7 + $0x810] sm:$0xff]  ;;  %v883_v55 = vld [vmem:[#allocation7 + $0x928] sm:$0xff] }
  0xd7   : > { %v850_v57 = vld [vmem:[#allocation7 + $0x820] sm:$0xff]  ;;  %v852_v3 = vld [vmem:[#allocation7 + $0x830] sm:$0xff] }
  0xd8   : > { %2014 = vmatpush1.bf16.msra.mxu0 %v2013_v11  ;;  %v823_v11 = vld [vmem:[#allocation7 + $0x748] sm:$0xff] }
  0xd9   : > { %2230 = vmatpush1.bf16.msra.mxu1 %v2229_v12  ;;  %2016 = vmatprep.subr.bf16.mxu0 %v2015_v13  ;;  %v827_v12 = vld [vmem:[#allocation7 + $0x768] sm:$0xff]  ;;  %v825_v13 = vld [vmem:[#allocation7 + $0x758] sm:$0xff] }
  0xda   : > { %2232 = vmatprep.subr.bf16.mxu1 %v2231_v18  ;;  %v2035_v18 = vpack.c.bf16 %v827_v12, %v823_v11  ;;  %v2251_v42 = vpack.c.bf16 %v829_v15, %v825_v13  ;;  %v2049_v11 = vpack.c.bf16 %v850_v57, %v846_v0  ;;  %v2265_v12 = vpack.c.bf16 %v852_v3, %v848_v1  ;;  %v854_v15 = vld [vmem:[#allocation7 + $0x840] sm:$0xff]  ;;  %v3009_v0 = vld [vmem:[#allocation7 + $0x948] sm:$0xff]  ;;  %v3013_v1 = vld [vmem:[#allocation7 + $0x958] sm:$0xff] }
  0xdb   : > { %v3011_v57 = vld [vmem:[#allocation7 + $0x968] sm:$0xff]  ;;  %v3015_v3 = vld [vmem:[#allocation7 + $0x978] sm:$0xff] }
  0xdc   : > { %2018 = vmatpush1.bf16.msra.mxu0 %v2017_v22  ;;  %v831_v22 = vld [vmem:[#allocation7 + $0x788] sm:$0xff] }
  0xdd   : > { %2234 = vmatpush1.bf16.msra.mxu1 %v2233_v23  ;;  %2020 = vmatprep.subr.bf16.mxu0 %v2019_v25  ;;  %v835_v23 = vld [vmem:[#allocation7 + $0x7a8] sm:$0xff]  ;;  %v833_v25 = vld [vmem:[#allocation7 + $0x798] sm:$0xff] }
  0xde   : > { %2236 = vmatprep.subr.bf16.mxu1 %v2235_v28  ;;  %v2039_v28 = vpack.c.bf16 %v835_v23, %v831_v22  ;;  %v2255_v33 = vpack.c.bf16 %v837_v26, %v833_v25  ;;  %v863_v22 = vld [vmem:[#allocation7 + $0x888] sm:$0xff]  ;;  %v865_v25 = vld [vmem:[#allocation7 + $0x898] sm:$0xff] }
  0xdf   : > { %v867_v23 = vld [vmem:[#allocation7 + $0x8a8] sm:$0xff]  ;;  %v869_v26 = vld [vmem:[#allocation7 + $0x8b8] sm:$0xff] }
  0xe0   : > { %2022 = vmatpush1.bf16.msra.mxu0 %v2021_v38  ;;  %v839_v38 = vld [vmem:[#allocation7 + $0x7c8] sm:$0xff]  ;;  %v2055_v29 = vpack.c.bf16 %v867_v23, %v863_v22  ;;  %v2271_v30 = vpack.c.bf16 %v869_v26, %v865_v25  ;;  %v2067_v25 = vpack.c.bf16 %v3011_v57, %v3009_v0  ;;  %v2283_v26 = vpack.c.bf16 %v3015_v3, %v3013_v1 }
  0xe1   : > { %2238 = vmatpush1.bf16.msra.mxu1 %v2237_v35  ;;  %2024 = vmatprep.subr.bf16.mxu0 %v2023_v39  ;;  %v843_v35 = vld [vmem:[#allocation7 + $0x7e8] sm:$0xff]  ;;  %v841_v39 = vld [vmem:[#allocation7 + $0x7d8] sm:$0xff] }
  0xe2   : > { %2240 = vmatprep.subr.bf16.mxu1 %v2239_v50  ;;  %v2043_v50 = vpack.c.bf16 %v843_v35, %v839_v38  ;;  %v2259_v54 = vpack.c.bf16 %v845_v41, %v841_v39  ;;  %v871_v38 = vld [vmem:[#allocation7 + $0x8c8] sm:$0xff]  ;;  %v873_v39 = vld [vmem:[#allocation7 + $0x8d8] sm:$0xff] }
  0xe3   : > { %v875_v35 = vld [vmem:[#allocation7 + $0x8e8] sm:$0xff]  ;;  %v877_v41 = vld [vmem:[#allocation7 + $0x8f8] sm:$0xff] }
  0xe4   : > { %2026 = vmatpush1.bf16.msra.mxu0 %v2025_v56  ;;  %v847_v56 = vld [vmem:[#allocation7 + $0x808] sm:$0xff] }
  0xe5   : > { %2242 = vmatpush1.bf16.msra.mxu1 %v2241_v58  ;;  %2028 = vmatprep.subr.bf16.mxu0 %v2027_v45  ;;  %v851_v58 = vld [vmem:[#allocation7 + $0x828] sm:$0xff]  ;;  %v849_v45 = vld [vmem:[#allocation7 + $0x818] sm:$0xff] }
  0xe6   : > { %2244 = vmatprep.subr.bf16.mxu1 %v2243_v62  ;;  %v2047_v62 = vpack.c.bf16 %v851_v58, %v847_v56  ;;  %v2263_v63 = vpack.c.bf16 %v853_v59, %v849_v45  ;;  %v881_v56 = vld [vmem:[#allocation7 + $0x918] sm:$0xff]  ;;  %v2059_v45 = vpack.c.bf16 %v875_v35, %v871_v38  ;;  %v2275_v59 = vpack.c.bf16 %v877_v41, %v873_v39  ;;  %v289_v39 = vld [vmem:[#allocation6 + $0x18] sm:$0xff]  ;;  %v287_v41 = vld [vmem:[#allocation6 + $0x8] sm:$0xff] }
  0xe7   : > { %v885_v58 = vld [vmem:[#allocation7 + $0x938] sm:$0xff] }
  0xe8   : > { %2030 = vmatpush1.bf16.msra.mxu0 %v2029_v4  ;;  %v855_v4 = vld [vmem:[#allocation7 + $0x848] sm:$0xff]  ;;  %v286_v35 = vld [vmem:[#allocation6] sm:$0xff] }
  0xe9   : > { %2246 = vmatpush1.bf16.msra.mxu1 %v2245_v5  ;;  %2032 = vmatprep.subr.bf16.mxu0 %v2031_v7  ;;  %v859_v5 = vld [vmem:[#allocation7 + $0x868] sm:$0xff] }
  0xea   : > { %2248 = vmatprep.subr.bf16.mxu1 %v2247_v10  ;;  %v2051_v13 = vpack.c.bf16 %v859_v5, %v855_v4  ;;  %v3017_v4 = vld [vmem:[#allocation7 + $0x940] sm:$0xff] }
  0xeb   : > { %v3019_v5 = vld [vmem:[#allocation7 + $0x960] sm:$0xff] }
  0xec   : > { %2034 = vmatpush1.bf16.msra.mxu0 %v2033_v16  ;;  %v858_v16 = vld [vmem:[#allocation7 + $0x860] sm:$0xff] }
  0xed   : > { %2250 = vmatpush1.bf16.msra.mxu1 %v2249_v17  ;;  %2036 = vmatprep.subr.bf16.mxu0 %v2035_v18 }
  0xee   : > { %2252 = vmatprep.subr.bf16.mxu1 %v2251_v42  ;;  %v856_v42 = vld [vmem:[#allocation7 + $0x850] sm:$0xff] }
  0xf0   : > { %2038 = vmatpush1.bf16.msra.mxu0 %v2037_v27  ;;  %v2053_v27 = vpack.c.bf16 %v858_v16, %v854_v15  ;;  %v3035_v15 = vld [vmem:[#allocation7 + $0x9a0] sm:$0xff]  ;;  %v3037_v16 = vld [vmem:[#allocation7 + $0x990] sm:$0xff] }
  0xf1   : > { %2254 = vmatpush1.bf16.msra.mxu1 %v2253_v36  ;;  %2040 = vmatprep.subr.bf16.mxu0 %v2039_v28  ;;  %v2269_v36 = vpack.c.bf16 %v860_v21, %v856_v42  ;;  %v862_v28 = vld [vmem:[#allocation7 + $0x880] sm:$0xff]  ;;  %v3041_v42 = vld [vmem:[#allocation7 + $0x9c8] sm:$0xff] }
  0xf2   : > { %2256 = vmatprep.subr.bf16.mxu1 %v2255_v33  ;;  %v864_v33 = vld [vmem:[#allocation7 + $0x890] sm:$0xff]  ;;  %v2057_v52 = vpack.c.bf16 %v866_v32, %v862_v28  ;;  %v3043_v21 = vld [vmem:[#allocation7 + $0x9e8] sm:$0xff] }
  0xf3   : > { %v2273_v53 = vpack.c.bf16 %v868_v34, %v864_v33  ;;  %v2075_v38 = vpack.c.bf16 %v3043_v21, %v3041_v42 }
  0xf4   : > { %2042 = vmatpush1.bf16.msra.mxu0 %v2041_v46  ;;  %v870_v46 = vld [vmem:[#allocation7 + $0x8c0] sm:$0xff] }
  0xf5   : > { %2258 = vmatpush1.bf16.msra.mxu1 %v2257_v49  ;;  %2044 = vmatprep.subr.bf16.mxu0 %v2043_v50  ;;  %v547_v6 = vpop.permute.xlu1 %546  ;;  %v874_v49 = vld [vmem:[#allocation7 + $0x8e0] sm:$0xff]  ;;  %v872_v50 = vld [vmem:[#allocation7 + $0x8d0] sm:$0xff] }
  0xf6   : > { %2260 = vmatprep.subr.bf16.mxu1 %v2259_v54  ;;  %v879_v54 = vld [vmem:[#allocation7 + $0x908] sm:$0xff] }
  0xf8   : > { %2046 = vmatpush1.bf16.msra.mxu0 %v2045_v44  ;;  %v2477_v7 = vpop.permute.xlu0 %2476  ;;  %v3001_v44 = vld [vmem:[#allocation7 + $0x900] sm:$0xff] }
  0xf9   : > { %2262 = vmatpush1.bf16.msra.mxu1 %v2261_v61  ;;  %2048 = vmatprep.subr.bf16.mxu0 %v2047_v62  ;;  %v2479_v9 = vunpack.i.h.bf16 %v2477_v7  ;;  %v2478_v10 = vunpack.i.l.bf16 %v2477_v7  ;;  %v3003_v61 = vld [vmem:[#allocation7 + $0x920] sm:$0xff]  ;;  %v3005_v62 = vld [vmem:[#allocation7 + $0x910] sm:$0xff] }
  0xfa   : > { %2264 = vmatprep.subr.bf16.mxu1 %v2263_v63  ;;  %v3007_v63 = vld [vmem:[#allocation7 + $0x930] sm:$0xff]  ;;  %v2065_v22 = vpack.c.bf16 %v3003_v61, %v3001_v44  ;;  %v3095_v61 = vld [vmem:[%s2876_s7 + $0x28] sm:$0xff] }
  0xfb   : > { %v2993_v17 = vsel %vm554_vm2, %v2479_v9, %v547_v6  ;;  %v555_v18 = vsel %vm554_vm2, %v2478_v10, %v2479_v9  ;;  %v586_v19 = vsel %vm554_vm2, %v2997_v43, %v2478_v10  ;;  %v3021_v7 = vld [vmem:[#allocation7 + $0x950] sm:$0xff]  ;;  %v3027_v9 = vld [vmem:[#allocation7 + $0x9a8] sm:$0xff]  ;;  %v3029_v10 = vld [vmem:[#allocation7 + $0x998] sm:$0xff]  ;;  %v2281_v23 = vpack.c.bf16 %v3007_v63, %v3005_v62 }
  0xfc   : > { %1189 = vmatprep.mubr.f32.mxu0 %v555_v18  ;;  %1497 = vmatprep.mubr.f32.mxu1 %v555_v18  ;;  %v3031_v6 = vld [vmem:[#allocation7 + $0x9b8] sm:$0xff]  ;;  %v2063_v18 = vpack.c.bf16 %v883_v55, %v879_v54  ;;  %v2071_v28 = vpack.c.bf16 %v3027_v9, %v3025_v37  ;;  %v288_v55 = vld [vmem:[#allocation6 + $0x10] sm:$0xff] }
  0xfd   : > { %1190 = vmatmul.mubr.f32.vlgmr.msra.gmra.mrb[0].mxu0 %v586_v19  ;;  %1498 = vmatmul.mubr.f32.vlgmr.msra.gmra.mrb[0].mxu1 %v586_v19  ;;  %v2279_v19 = vpack.c.bf16 %v885_v58, %v881_v56  ;;  %v2287_v32 = vpack.c.bf16 %v3031_v6, %v3029_v10  ;;  %v291_v56 = vld [vmem:[#allocation6 + $0x28] sm:$0xff]  ;;  %v297_v44 = vadd.f32 %v2997_v43, %v288_v55  ;;  %v3119_v58 = vld [vmem:[%s2876_s7 + $0x38] sm:$0x3] }
  0xfe   : > { %2050 = vmatpush1.bf16.msra.mxu0 %v2049_v11  ;;  %2266 = vmatpush1.bf16.msra.mxu1 %v2265_v12  ;;  %v2061_v11 = vpack.c.bf16 %v874_v49, %v870_v46  ;;  %v2277_v12 = vpack.c.bf16 %v876_v51, %v872_v50  ;;  %v3072_v46 = vld [vmem:[%s2876_s7] sm:$0xff]  ;;  %v3076_v50 = vld [vmem:[%s2876_s7 + $0x18] sm:$0xff]  ;;  %v3098_v62 = vadd.f32 %v3095_v61, %v291_v56 }
  0xff   : > { %2052 = vmatprep.subr.bf16.mxu0 %v2051_v13  ;;  %2268 = vmatprep.subr.bf16.mxu1 %v2267_v40  ;;  %v3033_v13 = vld [vmem:[#allocation7 + $0x980] sm:$0xff]  ;;  %v3039_v40 = vld [vmem:[#allocation7 + $0x9b0] sm:$0xff]  ;;  %v295_v49 = vadd.f32 %v3072_v46, %v286_v35  ;;  %v3079_v51 = vadd.f32 %v3076_v50, %v289_v39 }
 0x100   : > { %v2073_v33 = vpack.c.bf16 %v3035_v15, %v3033_v13  ;;  %v2289_v34 = vpack.c.bf16 %v3039_v40, %v3037_v16  ;;  %v293_v35 = vld [vmem:[#allocation6 + $0x38] sm:$0x3] }
 0x101   : > { %v314_v63 = vrot.slane %v295_v49, 1  ;;  %v315_v0 = vrot.slane %v3079_v51, 1  ;;  %v342_v57 = vrot.slane %v295_v49, 2  ;;  %v343_v1 = vrot.slane %v3079_v51, 2  ;;  %v912_v40 = vld [vmem:[#allocation7 + $0xa10] sm:$0xff] }
 0x102   : > { %2054 = vmatpush1.bf16.msra.mxu0 %v2053_v27  ;;  %2270 = vmatpush1.bf16.msra.mxu1 %v2269_v36  ;;  %v2069_v27 = vpack.c.bf16 %v3019_v5, %v3017_v4  ;;  %v2285_v36 = vpack.c.bf16 %v3023_v8, %v3021_v7  ;;  %v292_v8 = vld [vmem:[#allocation6 + $0x30] sm:$0x3] }
 0x103   : > { %2056 = vmatprep.subr.bf16.mxu0 %v2055_v29  ;;  %2272 = vmatprep.subr.bf16.mxu1 %v2271_v30  ;;  %v3061_v29 = vld [vmem:[#allocation7 + $0x9d8] sm:$0xff]  ;;  %v301_v56 = vadd.f32 %v292_v8, %v2940_v20  ;;  %v911_v20 = vld [vmem:[#allocation7 + $0xa08] sm:$0xff] }
 0x104   : > { %v3063_v30 = vld [vmem:[#allocation7 + $0x9f8] sm:$0xff] }
 0x105   : > { %v323_v8 = vrot.slane %v301_v56, 1  ;;  %v3412_v13 = vpack.c.bf16 %v3063_v30, %v3061_v29 }
 0x106   : > { %2058 = vmatpush1.bf16.msra.mxu0 %v2057_v52  ;;  %2274 = vmatpush1.bf16.msra.mxu1 %v2273_v53  ;;  %v290_v52 = vld [vmem:[#allocation6 + $0x20] sm:$0xff]  ;;  %v3082_v53 = vld [vmem:[%s2876_s7 + $0x8] sm:$0xff] }
 0x107   : > { %2060 = vmatprep.subr.bf16.mxu0 %v2059_v45  ;;  %2276 = vmatprep.subr.bf16.mxu1 %v2275_v59  ;;  %v296_v54 = vadd.f32 %v3082_v53, %v287_v41  ;;  %v3088_v45 = vld [vmem:[%s2876_s7 + $0x20] sm:$0xff]  ;;  %v348_v41 = vrot.slane %v297_v44, 2 }
 0x108   : > { %v3091_v59 = vadd.f32 %v3088_v45, %v290_v52  ;;  %v3109_v52 = vld [vmem:[#allocation7 + $0x9c0] sm:$0xff] }
 0x109   : > { %v317_v3 = vrot.slane %v296_v54, 1  ;;  %v345_v5 = vrot.slane %v296_v54, 2 }
 0x10a   : > { %2062 = vmatpush1.bf16.msra.mxu0 %v2061_v11  ;;  %2278 = vmatpush1.bf16.msra.mxu1 %v2277_v12  ;;  %v318_v4 = vrot.slane %v3091_v59, 1  ;;  %v346_v7 = vrot.slane %v3091_v59, 2  ;;  %v316_v11 = vsel %vm313_vm0, %v314_v63, %v315_v0  ;;  %v344_v12 = vsel %vm341_vm1, %v342_v57, %v343_v1  ;;  %v294_v63 = vld [vmem:[#allocation6 + $0x40] sm:$0x3]  ;;  %v904_v57 = vld [vmem:[#allocation7 + $0x9d0] sm:$0xff] }
 0x10b   : > { %2064 = vmatprep.subr.bf16.mxu0 %v2063_v18  ;;  %2280 = vmatprep.subr.bf16.mxu1 %v2279_v19  ;;  %v320_v18 = vrot.slane %v297_v44, 1  ;;  %v321_v19 = vrot.slane %v3098_v62, 1  ;;  %v335_v39 = vmax.f32 %v295_v49, %v316_v11  ;;  %v906_v49 = vld [vmem:[#allocation7 + $0x9e0] sm:$0xff]  ;;  %v303_v10 = vadd.f32 %v294_v63, %v2958_v47 }
 0x10c   : > { %v2077_v6 = vpack.c.bf16 %v906_v49, %v3109_v52  ;;  %v914_v47 = vld [vmem:[#allocation7 + $0xa20] sm:$0xff] }
 0x10d   : > { %v3116_v11 = vmax.f32 %v335_v39, %v344_v12  ;;  %v351_v12 = vrot.slane %v301_v56, 2  ;;  %v917_v39 = vld [vmem:[#allocation7 + $0xa38] sm:$0xff]  ;;  %v918_v63 = vld [vmem:[#allocation7 + $0xa40] sm:$0xff] }
 0x10e   : > { %2066 = vmatpush1.bf16.msra.mxu0 %v2065_v22  ;;  %2282 = vmatpush1.bf16.msra.mxu1 %v2281_v23  ;;  %v319_v22 = vsel %vm313_vm0, %v317_v3, %v318_v4  ;;  %v347_v23 = vsel %vm341_vm1, %v345_v5, %v346_v7  ;;  %v908_v3 = vld [vmem:[#allocation7 + $0x9f0] sm:$0xff]  ;;  %v922_v49 = vld [vmem:[#allocation7 + $0xa60] sm:$0xff] }
 0x10f   : > { %2068 = vmatprep.subr.bf16.mxu0 %v2067_v25  ;;  %2284 = vmatprep.subr.bf16.mxu1 %v2283_v26  ;;  %v336_v55 = vmax.f32 %v296_v54, %v319_v22  ;;  %v322_v25 = vsel %vm313_vm0, %v320_v18, %v321_v19  ;;  %v349_v26 = vrot.slane %v3098_v62, 2  ;;  %v302_v54 = vadd.f32 %v3119_v58, %v293_v35  ;;  %v913_v18 = vld [vmem:[#allocation7 + $0xa18] sm:$0xff] }
 0x110   : > { %v337_v5 = vmax.f32 %v297_v44, %v322_v25  ;;  %v915_v44 = vld [vmem:[#allocation7 + $0xa28] sm:$0xff]  ;;  %375 = vrot.lane.b32.xlu0 %v3116_v11, %s2677_s9  ;;  %v324_v35 = vsel %vm313_vm0, %v315_v0, %v323_v8  ;;  %v352_v22 = vsel %vm341_vm1, %v343_v1, %v351_v12  ;;  %v327_v25 = vrot.slane %v303_v10, 1  ;;  %v933_v8 = vld [vmem:[#allocation7 + $0xab8] sm:$0xff] }
 0x111   : > { %v325_v9 = vrot.slane %v302_v54, 1  ;;  %v2079_v15 = vpack.c.bf16 %v915_v44, %v911_v20  ;;  %v2295_v16 = vpack.c.bf16 %v917_v39, %v913_v18  ;;  %v355_v0 = vrot.slane %v303_v10, 2  ;;  %v923_v1 = vld [vmem:[#allocation7 + $0xa68] sm:$0xff]  ;;  %v926_v18 = vld [vmem:[#allocation7 + $0xa80] sm:$0xff] }
 0x112   : > { %2070 = vmatpush1.bf16.msra.mxu0 %v2069_v27  ;;  %2286 = vmatpush1.bf16.msra.mxu1 %v2285_v36  ;;  %v3128_v27 = vmax.f32 %v336_v55, %v347_v23  ;;  %v350_v36 = vsel %vm341_vm1, %v348_v41, %v349_v26  ;;  %v910_v23 = vld [vmem:[#allocation7 + $0xa00] sm:$0xff]  ;;  %v338_v41 = vmax.f32 %v3079_v51, %v324_v35  ;;  %v927_v20 = vld [vmem:[#allocation7 + $0xa88] sm:$0xff]  ;;  %v932_v35 = vld [vmem:[#allocation7 + $0xab0] sm:$0xff] }
 0x113   : > { %2072 = vmatprep.subr.bf16.mxu0 %v2071_v28  ;;  %2288 = vmatprep.subr.bf16.mxu1 %v2287_v32  ;;  %v3133_v37 = vmax.f32 %v337_v5, %v350_v36  ;;  %v353_v28 = vrot.slane %v302_v54, 2  ;;  %v2293_v32 = vpack.c.bf16 %v908_v3, %v904_v57  ;;  %v326_v52 = vsel %vm313_vm0, %v318_v4, %v325_v9  ;;  %v921_v4 = vld [vmem:[#allocation7 + $0xa58] sm:$0xff]  ;;  %v920_v5 = vld [vmem:[#allocation7 + $0xa50] sm:$0xff]  ;;  %v930_v39 = vld [vmem:[#allocation7 + $0xaa0] sm:$0xff] }
 0x114   : > { %377 = vrot.lane.b32.xlu1 %v3128_v27, %s2677_s9  ;;  %v339_v51 = vmax.f32 %v3091_v59, %v326_v52  ;;  %v3159_v42 = vmax.f32 %v338_v41, %v352_v22  ;;  %v328_v21 = vsel %vm313_vm0, %v321_v19, %v327_v25  ;;  %v2081_v59 = vpack.c.bf16 %v914_v47, %v910_v23  ;;  %v924_v54 = vld [vmem:[#allocation7 + $0xa70] sm:$0xff]  ;;  %v931_v19 = vld [vmem:[#allocation7 + $0xaa8] sm:$0xff]  ;;  %v929_v36 = vld [vmem:[#allocation7 + $0xa98] sm:$0xff] }
 0x115   : > { %v354_v55 = vsel %vm341_vm1, %v346_v7, %v353_v28  ;;  %v925_v7 = vld [vmem:[#allocation7 + $0xa78] sm:$0xff]  ;;  %379 = vrot.lane.b32.xlu0 %v3133_v37, %s2677_s9  ;;  %v340_v30 = vmax.f32 %v3098_v62, %v328_v21  ;;  %v2085_v12 = vpack.c.bf16 %v922_v49, %v918_v63  ;;  %v2301_v44 = vpack.c.bf16 %v924_v54, %v920_v5  ;;  %v935_v22 = vld [vmem:[#allocation7 + $0xac8] sm:$0xff]  ;;  %v942_v63 = vld [vmem:[#allocation7 + $0xb00] sm:$0xff] }
 0x116   : > { %2074 = vmatpush1.bf16.msra.mxu0 %v2073_v33  ;;  %2290 = vmatpush1.bf16.msra.mxu1 %v2289_v34  ;;  %v916_v33 = vld [vmem:[#allocation7 + $0xa30] sm:$0xff]  ;;  %v919_v34 = vld [vmem:[#allocation7 + $0xa48] sm:$0xff]  ;;  %v3164_v29 = vmax.f32 %v339_v51, %v354_v55  ;;  %v2299_v3 = vpack.c.bf16 %v925_v7, %v921_v4  ;;  %v2087_v10 = vpack.c.bf16 %v931_v19, %v927_v20  ;;  %v937_v47 = vld [vmem:[#allocation7 + $0xad8] sm:$0xff]  ;;  %v3185_v55 = vpop.permute.xlu1 %565 }
 0x117   : > { %2076 = vmatprep.subr.bf16.mxu0 %v2075_v38  ;;  %2292 = vmatprep.subr.bf16.mxu1 %v3412_v13  ;;  %v356_v38 = vsel %vm341_vm1, %v349_v26, %v355_v0  ;;  %v2297_v56 = vpack.c.bf16 %v916_v33, %v912_v40  ;;  %v2083_v57 = vpack.c.bf16 %v923_v1, %v919_v34  ;;  %v3174_v26 = vpop.permute.xlu0 %2481  ;;  %v939_v23 = vld [vmem:[#allocation7 + $0xae8] sm:$0xff]  ;;  %v941_v41 = vld [vmem:[#allocation7 + $0xaf8] sm:$0xff]  ;;  %v934_v40 = vld [vmem:[#allocation7 + $0xac0] sm:$0xff] }
 0x118   : > { %381 = vrot.lane.b32.xlu1 %v3159_v42, %s2677_s9  ;;  %v3172_v62 = vmax.f32 %v340_v30, %v356_v38  ;;  %v2484_v9 = vunpack.i.h.bf16 %v3174_v26  ;;  %v2483_v28 = vunpack.i.l.bf16 %v3174_v26  ;;  %v938_v33 = vld [vmem:[#allocation7 + $0xae0] sm:$0xff]  ;;  %v2091_v51 = vpack.c.bf16 %v939_v23, %v935_v22  ;;  %v936_v1 = vld [vmem:[#allocation7 + $0xad0] sm:$0xff]  ;;  %v943_v7 = vld [vmem:[#allocation7 + $0xb08] sm:$0xff] }
 0x119   : > { %383 = vrot.lane.b32.xlu0 %v3164_v29, %s2677_s9  ;;  %v2307_v0 = vpack.c.bf16 %v941_v41, %v937_v47  ;;  %v940_v4 = vld [vmem:[#allocation7 + $0xaf0] sm:$0xff]  ;;  %v947_v21 = vld [vmem:[#allocation7 + $0xb28] sm:$0xff]  ;;  %v945_v30 = vld [vmem:[#allocation7 + $0xb18] sm:$0xff] }
 0x11a   : > { %2078 = vmatpush1.bf16.msra.mxu0 %v2077_v6  ;;  %2294 = vmatpush1.bf16.msra.mxu1 %v2293_v32  ;;  %v2303_v6 = vpack.c.bf16 %v933_v8, %v929_v36  ;;  %v928_v32 = vld [vmem:[#allocation7 + $0xa90] sm:$0xff]  ;;  %v557_v52 = vsel %vm554_vm2, %v2483_v28, %v2484_v9  ;;  %v587_v13 = vsel %vm554_vm2, %v3095_v61, %v2483_v28  ;;  %v949_v38 = vld [vmem:[#allocation7 + $0xb38] sm:$0xff]  ;;  %v946_v49 = vld [vmem:[#allocation7 + $0xb20] sm:$0xff] }
 0x11b   : > { %2080 = vmatprep.subr.bf16.mxu0 %v2079_v15  ;;  %2296 = vmatprep.subr.bf16.mxu1 %v2295_v16  ;;  %v3187_v25 = vpop.permute.xlu0 %567  ;;  %v2089_v15 = vpack.c.bf16 %v930_v39, %v926_v18  ;;  %v2305_v16 = vpack.c.bf16 %v932_v35, %v928_v32  ;;  %v944_v5 = vld [vmem:[#allocation7 + $0xb10] sm:$0xff]  ;;  %v951_v20 = vld [vmem:[#allocation7 + $0xb48] sm:$0xff]  ;;  %v953_v36 = vld [vmem:[#allocation7 + $0xb58] sm:$0xff] }
 0x11c   : > { %385 = vrot.lane.b32.xlu1 %v3172_v62, %s2677_s9  ;;  %1195 = vmatprep.mubr.f32.mxu0 %v557_v52  ;;  %v578_v34 = vsel %vm577_vm3, %v3185_v55, %v3187_v25  ;;  %v948_v54 = vld [vmem:[#allocation7 + $0xb30] sm:$0xff]  ;;  %v955_v19 = vld [vmem:[#allocation7 + $0xb68] sm:$0xff]  ;;  %v957_v8 = vld [vmem:[#allocation7 + $0xb78] sm:$0xff] }
 0x11d   : > { %494 = vrot.lane.b32.xlu0 %v2917_v14, %s2677_s9  ;;  %1503 = vmatprep.mubr.f32.mxu1 %v557_v52  ;;  %v950_v18 = vld [vmem:[#allocation7 + $0xb40] sm:$0xff]  ;;  %v2099_v28 = vpack.c.bf16 %v955_v19, %v951_v20  ;;  %v956_v32 = vld [vmem:[#allocation7 + $0xb70] sm:$0xff]  ;;  %v959_v35 = vld [vmem:[#allocation7 + $0xb88] sm:$0xff]  ;;  %v553_v20 = vpop.permute.xlu1 %552 }
 0x11e   : > { %2082 = vmatpush1.bf16.msra.mxu0 %v2081_v59  ;;  %2298 = vmatpush1.bf16.msra.mxu1 %v2297_v56  ;;  %v2093_v59 = vpack.c.bf16 %v938_v33, %v934_v40  ;;  %v2309_v56 = vpack.c.bf16 %v940_v4, %v936_v1  ;;  %v954_v39 = vld [vmem:[#allocation7 + $0xb60] sm:$0xff]  ;;  %v963_v22 = vld [vmem:[#allocation7 + $0xba8] sm:$0xff]  ;;  %v961_v23 = vld [vmem:[#allocation7 + $0xb98] sm:$0xff] }
 0x11f   : > { %2084 = vmatprep.subr.bf16.mxu0 %v2083_v57  ;;  %2300 = vmatprep.subr.bf16.mxu1 %v2299_v3  ;;  %v2095_v57 = vpack.c.bf16 %v947_v21, %v943_v7  ;;  %v2311_v3 = vpack.c.bf16 %v949_v38, %v945_v30  ;;  %v965_v47 = vld [vmem:[#allocation7 + $0xbb8] sm:$0xff]  ;;  %v2101_v41 = vpack.c.bf16 %v954_v39, %v950_v18  ;;  %v960_v33 = vld [vmem:[#allocation7 + $0xb90] sm:$0xff]  ;;  %v966_v30 = vld [vmem:[#allocation7 + $0xbc0] sm:$0xff] }
 0x120   : > { %1196 = vmatmul.mubr.f32.gmra.mrb[2].mxu0 %v587_v13  ;;  %1504 = vmatmul.mubr.f32.gmra.mrb[2].mxu1 %v587_v13  ;;  %v958_v13 = vld [vmem:[#allocation7 + $0xb80] sm:$0xff]  ;;  %v2319_v40 = vpack.c.bf16 %v965_v47, %v961_v23  ;;  %v969_v1 = vld [vmem:[#allocation7 + $0xbd8] sm:$0xff]  ;;  %v976_v39 = vld [vmem:[#allocation7 + $0xc10] sm:$0xff] }
 0x121   : > { %1266 = vmatprep.mubr.f32.mxu0 %v578_v34  ;;  %1574 = vmatprep.mubr.f32.mxu1 %v578_v34  ;;  %v964_v34 = vld [vmem:[#allocation7 + $0xbb0] sm:$0xff]  ;;  %v973_v4 = vld [vmem:[#allocation7 + $0xbf8] sm:$0xff]  ;;  %v970_v38 = vld [vmem:[#allocation7 + $0xbe0] sm:$0xff] }
 0x122   : > { %2086 = vmatpush1.bf16.msra.mxu0 %v2085_v12  ;;  %2302 = vmatpush1.bf16.msra.mxu1 %v2301_v44  ;;  %v2097_v12 = vpack.c.bf16 %v946_v49, %v942_v63  ;;  %v2313_v44 = vpack.c.bf16 %v948_v54, %v944_v5  ;;  %v2321_v21 = vpack.c.bf16 %v964_v34, %v960_v33  ;;  %v968_v63 = vld [vmem:[#allocation7 + $0xbd0] sm:$0xff]  ;;  %v977_v5 = vld [vmem:[#allocation7 + $0xc18] sm:$0xff]  ;;  %v978_v18 = vld [vmem:[#allocation7 + $0xc20] sm:$0xff] }
 0x123   : > { %2088 = vmatprep.subr.bf16.mxu0 %v2087_v10  ;;  %2304 = vmatprep.subr.bf16.mxu1 %v2303_v6  ;;  %v2315_v10 = vpack.c.bf16 %v957_v8, %v953_v36  ;;  %v952_v6 = vld [vmem:[#allocation7 + $0xb50] sm:$0xff]  ;;  %v981_v54 = vld [vmem:[#allocation7 + $0xc38] sm:$0xff]  ;;  %v2109_v19 = vpack.c.bf16 %v970_v38, %v966_v30  ;;  %v974_v8 = vld [vmem:[#allocation7 + $0xc00] sm:$0xff]  ;;  %v3231_v38 = vstv %s3210_s12 }
 0x124   : > { %496 = vrot.lane.b32.xlu1 %v2928_v31, %s2677_s9  ;;  %498 = vrot.lane.b32.xlu0 %v2937_v48, %s2677_s9  ;;  %v2317_v52 = vpack.c.bf16 %v956_v32, %v952_v6  ;;  %v972_v49 = vld [vmem:[#allocation7 + $0xbf0] sm:$0xff]  ;;  %v987_v6 = vld [vmem:[#allocation7 + $0xc68] sm:$0xff]  ;;  %v985_v32 = vld [vmem:[#allocation7 + $0xc58] sm:$0xff] }
 0x125   : > { %v2325_v36 = vpack.c.bf16 %v972_v49, %v968_v63  ;;  %v982_v47 = vld [vmem:[#allocation7 + $0xc40] sm:$0xff]  ;;  %v996_v63 = vld [vmem:[#allocation7 + $0xcb0] sm:$0xff]  ;;  %v999_v49 = vld [vmem:[#allocation7 + $0xcc8] sm:$0xff] }
 0x126   : > { %2090 = vmatpush1.bf16.msra.mxu0 %v2089_v15  ;;  %2306 = vmatpush1.bf16.msra.mxu1 %v2305_v16  ;;  %v962_v15 = vld [vmem:[#allocation7 + $0xba0] sm:$0xff]  ;;  %v2103_v16 = vpack.c.bf16 %v963_v22, %v959_v35  ;;  %v989_v35 = vld [vmem:[#allocation7 + $0xc78] sm:$0xff]  ;;  %v2113_v22 = vpack.c.bf16 %v978_v18, %v974_v8  ;;  %v1000_v18 = vld [vmem:[#allocation7 + $0xcd0] sm:$0xff] }
 0x127   : > { %2092 = vmatprep.subr.bf16.mxu0 %v2091_v51  ;;  %2308 = vmatprep.subr.bf16.mxu1 %v2307_v0  ;;  %v967_v51 = vld [vmem:[#allocation7 + $0xbc8] sm:$0xff]  ;;  %v2105_v7 = vpack.c.bf16 %v962_v15, %v958_v13  ;;  %v572_v13 = vpop.permute.xlu0 %571  ;;  %v984_v15 = vld [vmem:[#allocation7 + $0xc50] sm:$0xff]  ;;  %v994_v30 = vld [vmem:[#allocation7 + $0xca0] sm:$0xff] }
 0x128   : > { %500 = vrot.lane.b32.xlu1 %v2960_v60, %s2677_s9  ;;  %502 = vrot.lane.b32.xlu0 %v2966_v2, %s2677_s9  ;;  %v971_v0 = vld [vmem:[#allocation7 + $0xbe8] sm:$0xff]  ;;  %v1002_v8 = vld [vmem:[#allocation7 + $0xce0] sm:$0xff] }
 0x12a   : > { %2094 = vmatpush1.bf16.msra.mxu0 %v2093_v59  ;;  %2310 = vmatpush1.bf16.msra.mxu1 %v2309_v56  ;;  %v2107_v59 = vpack.c.bf16 %v971_v0, %v967_v51  ;;  %v2323_v56 = vpack.c.bf16 %v973_v4, %v969_v1  ;;  %v2331_v51 = vpack.c.bf16 %v989_v35, %v985_v32  ;;  %v995_v0 = vld [vmem:[#allocation7 + $0xca8] sm:$0xff]  ;;  %v993_v1 = vld [vmem:[#allocation7 + $0xc98] sm:$0xff]  ;;  %v2679_v32 = vmov 0.0  }
 0x12b   : > { %2096 = vmatprep.subr.bf16.mxu0 %v2095_v57  ;;  %2312 = vmatprep.subr.bf16.mxu1 %v2311_v3  ;;  %v975_v57 = vld [vmem:[#allocation7 + $0xc08] sm:$0xff]  ;;  %v997_v4 = vld [vmem:[#allocation7 + $0xcb8] sm:$0xff] }
 0x12c   : > { %504 = vrot.lane.b32.xlu1 %v2979_v24, %s2677_s9  ;;  %400 = vrot.lane.b32.xlu0 %v3116_v11, %s2678_s11  ;;  %v979_v3 = vld [vmem:[#allocation7 + $0xc28] sm:$0xff] }
 0x12e   : > { %2098 = vmatpush1.bf16.msra.mxu0 %v2097_v12  ;;  %2314 = vmatpush1.bf16.msra.mxu1 %v2313_v44  ;;  %v2111_v12 = vpack.c.bf16 %v979_v3, %v975_v57  ;;  %v2327_v44 = vpack.c.bf16 %v981_v54, %v977_v5  ;;  %v1001_v57 = vld [vmem:[#allocation7 + $0xcd8] sm:$0xff]  ;;  %v1693_v5 = vmul.f32 %v3072_v46, %v3231_v38 }
 0x12f   : > { %2100 = vmatprep.subr.bf16.mxu0 %v2099_v28  ;;  %2316 = vmatprep.subr.bf16.mxu1 %v2315_v10  ;;  %v980_v28 = vld [vmem:[#allocation7 + $0xc30] sm:$0xff]  ;;  %v983_v10 = vld [vmem:[#allocation7 + $0xc48] sm:$0xff]  ;;  %v1005_v3 = vld [vmem:[#allocation7 + $0xcf8] sm:$0xff]  ;;  %v3238_v54 = vmul.f32 %v3076_v50, %v3231_v38  ;;  %v1694_v50 = vmul.f32 %v3082_v53, %v3231_v38 }
 0x130   : > { %402 = vrot.lane.b32.xlu1 %v3128_v27, %s2678_s11  ;;  %404 = vrot.lane.b32.xlu0 %v3133_v37, %s2678_s11  ;;  %v3216_v37 = vpop.permute.xlu1 %573  ;;  %v2329_v23 = vpack.c.bf16 %v980_v28, %v976_v39  ;;  %v2115_v34 = vpack.c.bf16 %v987_v6, %v983_v10  ;;  %v1004_v39 = vld [vmem:[#allocation7 + $0xcf0] sm:$0xff]  ;;  %v1007_v28 = vld [vmem:[#allocation7 + $0xd08] sm:$0xff]  ;;  %v1009_v6 = vld [vmem:[#allocation7 + $0xd18] sm:$0xff]  ;;  %v1711_v35 = vrot.slane %v1693_v5, 1 }
 0x131   : > { %v580_v33 = vsel %vm577_vm3, %v572_v13, %v3216_v37  ;;  %v1011_v10 = vld [vmem:[#allocation7 + $0xd28] sm:$0xff]  ;;  %v1013_v46 = vld [vmem:[#allocation7 + $0xd38] sm:$0xff]  ;;  %v2341_v53 = vpack.c.bf16 %v1004_v39, %v1000_v18 }
 0x132   : > { %2102 = vmatpush1.bf16.msra.mxu0 %v2101_v41  ;;  %2318 = vmatpush1.bf16.msra.mxu1 %v2317_v52  ;;  %v986_v41 = vld [vmem:[#allocation7 + $0xc60] sm:$0xff]  ;;  %v588_v52 = vsel %vm577_vm3, %v2993_v17, %v3185_v55  ;;  %v558_v17 = vsel %vm554_vm2, %v2484_v9, %v553_v20  ;;  %v1003_v9 = vld [vmem:[#allocation7 + $0xce8] sm:$0xff] }
 0x133   : > { %2104 = vmatprep.subr.bf16.mxu0 %v2103_v16  ;;  %2320 = vmatprep.subr.bf16.mxu1 %v2319_v40  ;;  %v988_v16 = vld [vmem:[#allocation7 + $0xc70] sm:$0xff]  ;;  %v991_v40 = vld [vmem:[#allocation7 + $0xc88] sm:$0xff]  ;;  %v2117_v55 = vpack.c.bf16 %v986_v41, %v982_v47  ;;  %v589_v26 = vsel %vm577_vm3, %v558_v17, %v572_v13  ;;  %v1695_v47 = vmul.f32 %v2997_v43, %v3231_v38  ;;  %v1010_v13 = vld [vmem:[#allocation7 + $0xd20] sm:$0xff] }
 0x134   : > { %406 = vrot.lane.b32.xlu1 %v3159_v42, %s2678_s11  ;;  %408 = vrot.lane.b32.xlu0 %v3164_v29, %s2678_s11  ;;  %v1021_v43 = vld [vmem:[#allocation7 + $0xd78] sm:$0xff] }
 0x136   : > { %2106 = vmatpush1.bf16.msra.mxu0 %v2105_v7  ;;  %2322 = vmatpush1.bf16.msra.mxu1 %v2321_v21  ;;  %v2333_v7 = vpack.c.bf16 %v988_v16, %v984_v15  ;;  %v990_v21 = vld [vmem:[#allocation7 + $0xc80] sm:$0xff]  ;;  %v3257_v15 = vmul.f32 %v3095_v61, %v3231_v38  ;;  %v2343_v16 = vpack.c.bf16 %v1013_v46, %v1009_v6 }
 0x137   : > { %2108 = vmatprep.subr.bf16.mxu0 %v2107_v59  ;;  %2324 = vmatprep.subr.bf16.mxu1 %v2323_v56  ;;  %v2335_v59 = vpack.c.bf16 %v997_v4, %v993_v1  ;;  %v992_v56 = vld [vmem:[#allocation7 + $0xc90] sm:$0xff]  ;;  %v2121_v20 = vpack.c.bf16 %v994_v30, %v990_v21 }
 0x138   : > { %410 = vrot.lane.b32.xlu1 %v3172_v62, %s2678_s11  ;;  %518 = vrot.lane.b32.xlu0 %v2917_v14, %s2678_s11  ;;  %v2119_v62 = vpack.c.bf16 %v995_v0, %v991_v40  ;;  %v1008_v40 = vld [vmem:[#allocation7 + $0xd10] sm:$0xff]  ;;  %v1714_v0 = vrot.slane %v1694_v50, 1  ;;  %v1718_v21 = vrot.slane %v3257_v15, 1 }
 0x13a   : > { %2110 = vmatpush1.bf16.msra.mxu0 %v2109_v19  ;;  %2326 = vmatpush1.bf16.msra.mxu1 %v2325_v36  ;;  %v2337_v19 = vpack.c.bf16 %v996_v63, %v992_v56  ;;  %v998_v36 = vld [vmem:[#allocation7 + $0xcc0] sm:$0xff]  ;;  %v1016_v56 = vld [vmem:[#allocation7 + $0xd50] sm:$0xff] }
 0x13b   : > { %2112 = vmatprep.subr.bf16.mxu0 %v2111_v12  ;;  %2328 = vmatprep.subr.bf16.mxu1 %v2327_v44  ;;  %v2123_v12 = vpack.c.bf16 %v1003_v9, %v999_v49  ;;  %v2339_v44 = vpack.c.bf16 %v1005_v3, %v1001_v57  ;;  %v2125_v41 = vpack.c.bf16 %v1002_v8, %v998_v36  ;;  %v1020_v63 = vld [vmem:[#allocation7 + $0xd70] sm:$0xff]  ;;  %v2492_v49 = vld [vmem:[%s2876_s7 + $0x30] sm:$0x3]  ;;  %v2493_v8 = vld [vmem:[%s2876_s7 + $0x40] sm:$0x3] }
 0x13c   : > { %520 = vrot.lane.b32.xlu1 %v2928_v31, %s2678_s11  ;;  %522 = vrot.lane.b32.xlu0 %v2937_v48, %s2678_s11  ;;  %v2127_v48 = vpack.c.bf16 %v1011_v10, %v1007_v28  ;;  %v1700_v9 = vmul.f32 %v3119_v58, %v3231_v38  ;;  %v2349_v5 = vpack.c.bf16 %v1020_v63, %v1016_v56  ;;  %v576_v28 = vpop.permute.xlu1 %575 }
 0x13d   : > { %1267 = vmatmul.mubr.f32.vlgmr.msra.gmra.mrb[0].mxu0 %v588_v52  ;;  %1575 = vmatmul.mubr.f32.vlgmr.msra.gmra.mrb[0].mxu1 %v588_v52  ;;  %v1006_v52 = vld [vmem:[#allocation7 + $0xd00] sm:$0xff]  ;;  %v1701_v58 = vmul.f32 %v2493_v8, %v3231_v38 }
 0x13e   : > { %2114 = vmatpush1.bf16.msra.mxu0 %v2113_v22  ;;  %2330 = vmatpush1.bf16.msra.mxu1 %v2329_v23  ;;  %v1712_v22 = vrot.slane %v3238_v54, 1  ;;  %v3251_v23 = vmul.f32 %v3088_v45, %v3231_v38  ;;  %v1012_v45 = vld [vmem:[#allocation7 + $0xd30] sm:$0xff]  ;;  %v2129_v4 = vpack.c.bf16 %v1010_v13, %v1006_v52  ;;  %v1722_v36 = vrot.slane %v1700_v9, 1 }
 0x13f   : > { %1272 = vmatprep.mubr.f32.mxu0 %v580_v33  ;;  %1580 = vmatprep.mubr.f32.mxu1 %v580_v33  ;;  %v1015_v33 = vld [vmem:[#allocation7 + $0xd48] sm:$0xff]  ;;  %v2345_v17 = vpack.c.bf16 %v1012_v45, %v1008_v40  ;;  %v1724_v39 = vrot.slane %v1701_v58, 1 }
 0x140   : > { %2116 = vmatprep.subr.bf16.mxu0 %v2115_v34  ;;  %2332 = vmatprep.subr.bf16.mxu1 %v2331_v51  ;;  %v1019_v34 = vld [vmem:[#allocation7 + $0xd68] sm:$0xff]  ;;  %v1017_v51 = vld [vmem:[#allocation7 + $0xd58] sm:$0xff]  ;;  %v1713_v61 = vsel %vm313_vm0, %v1711_v35, %v1712_v22  ;;  %v1715_v1 = vrot.slane %v3251_v23, 1 }
 0x141   : > { %1273 = vmatmul.mubr.f32.gmra.mrb[2].mxu0 %v589_v26  ;;  %1581 = vmatmul.mubr.f32.gmra.mrb[2].mxu1 %v589_v26  ;;  %v2131_v30 = vpack.c.bf16 %v1019_v34, %v1015_v33  ;;  %v1699_v26 = vmul.f32 %v2492_v49, %v3231_v38  ;;  %v1725_v38 = vsel %vm313_vm0, %v1718_v21, %v1724_v39  ;;  %v1022_v39 = vld [vmem:[#allocation9] sm:$0xf] }
 0x142   : > { %2118 = vmatpush1.bf16.msra.mxu0 %v2117_v55  ;;  %2334 = vmatpush1.bf16.msra.mxu1 %v2333_v7  ;;  %v1014_v55 = vld [vmem:[#allocation7 + $0xd40] sm:$0xff]  ;;  %v1717_v7 = vrot.slane %v1695_v47, 1  ;;  %v1716_v57 = vsel %vm313_vm0, %v1714_v0, %v1715_v1  ;;  %v1723_v18 = vsel %vm313_vm0, %v1715_v1, %v1722_v36 }
 0x143   : > { %2120 = vmatprep.subr.bf16.mxu0 %v2119_v62  ;;  %2336 = vmatprep.subr.bf16.mxu1 %v2335_v59  ;;  %v2347_v62 = vpack.c.bf16 %v1021_v43, %v1017_v51  ;;  %v1018_v59 = vld [vmem:[#allocation7 + $0xd60] sm:$0xff] }
 0x144   : > { %1343 = vmatprep.mubr.f32.mxu0 %v2679_v32  ;;  %1651 = vmatprep.mubr.f32.mxu1 %v2679_v32  ;;  %v2133_v3 = vpack.c.bf16 %v1018_v59, %v1014_v55 }
 0x145   : > { %524 = vrot.lane.b32.xlu1 %v2960_v60, %s2678_s11  ;;  %526 = vrot.lane.b32.xlu0 %v2966_v2, %s2678_s11 }
 0x146   : > { %2122 = vmatpush1.bf16.msra.mxu0 %v2121_v20  ;;  %2338 = vmatpush1.bf16.msra.mxu1 %v2337_v19  ;;  %v1719_v20 = vsel %vm313_vm0, %v1717_v7, %v1718_v21  ;;  %v1720_v19 = vrot.slane %v1699_v26, 1 }
 0x147   : > { %2124 = vmatprep.subr.bf16.mxu0 %v2123_v12  ;;  %2340 = vmatprep.subr.bf16.mxu1 %v2339_v44  ;;  %v570_v12 = vpop.permute.xlu0 %569 }
 0x148   : > { %v1721_v44 = vsel %vm313_vm0, %v1712_v22, %v1720_v19 }
 0x149   : > { %528 = vrot.lane.b32.xlu1 %v2979_v24, %s2678_s11  ;;  %1726 = vrot.lane.b32.xlu0 %v1713_v61, %s2677_s9  ;;  %v579_v24 = vsel %vm577_vm3, %v3187_v25, %v570_v12  ;;  %v581_v25 = vsel %vm577_vm3, %v3216_v37, %v576_v28 }
 0x14a   : > { %2126 = vmatpush1.bf16.msra.mxu0 %v2125_v41  ;;  %2342 = vmatpush1.bf16.msra.mxu1 %v2341_v53 }
 0x14b   : > { %2128 = vmatprep.subr.bf16.mxu0 %v2127_v48  ;;  %2344 = vmatprep.subr.bf16.mxu1 %v2343_v16 }
 0x14d   : > { %1728 = vrot.lane.b32.xlu1 %v1716_v57, %s2677_s9  ;;  %1730 = vrot.lane.b32.xlu0 %v1719_v20, %s2677_s9 }
 0x14e   : > { %2130 = vmatpush1.bf16.msra.mxu0 %v2129_v4  ;;  %2346 = vmatpush1.bf16.msra.mxu1 %v2345_v17  ;;  %v1024_v17 = vlaneseq }
 0x14f   : > { %2132 = vmatprep.subr.bf16.mxu0 %v2131_v30  ;;  %2348 = vmatprep.subr.bf16.mxu1 %v2347_v62 }
 0x150   : > { %v1025_v9 = vshrl.u32 %v1024_v17, 7  ;;  %v1750_v17 = vstv %s3326_s27 }
 0x151   : > { %1732 = vrot.lane.b32.xlu1 %v1721_v44, %s2677_s9  ;;  %1734 = vrot.lane.b32.xlu0 %v1723_v18, %s2677_s9 }
 0x152   : > { %2134 = vmatpush1.bf16.msra.mxu0 %v2133_v3  ;;  %2350 = vmatpush1.bf16.msra.mxu1 %v2349_v5  ;;  %v1683_v5 = vstv %s1674_s15  ;;  %v1026_v28 = vsub.s32 0, %v1025_v9 }
 0x155   : > { %1905 = vmatmul.mubr.msk.f32.vlgmr.msra.gmra.mrb[0].mxu0 %vm412_vm4, %v579_v24  ;;  %1907 = vmatmul.mubr.msk.f32.vlgmr.msra.gmra.mrb[0].mxu1 %vm412_vm4, %v579_v24 }
 0x156   : > { %1349 = vmatprep.mubr.f32.mxu0 %v2679_v32  ;;  %1657 = vmatprep.mubr.f32.mxu1 %v2679_v32 }
 0x157   : > { %1736 = vrot.lane.b32.xlu1 %v1725_v38, %s2677_s9  ;;  %s2680_s9 = smov [#allocation10]  }
 0x158   : > { %s2595_s11 = sshll.u32 %s2680_s9, 4  ;;  %s2596_s11 = int_to_ptr.vmem [resolvable:$false] %s2595_s11 }
 0x159   : > { %1906 = vmatmul.mubr.msk.f32.gmra.mrb[2].mxu0 %vm412_vm4, %v581_v25  ;;  %1908 = vmatmul.mubr.msk.f32.gmra.mrb[2].mxu1 %vm412_vm4, %v581_v25  ;;  %v1034_v25 = vsub.s32 2, %v1025_v9  ;;  %s2597_s12 = scalar_lea.vmem %s2596_s11, 1024  ;;  %p2598_p9 = scmp.lt.s32.totalorder %s3345_s8, %s2596_s11 }
 0x15a   : > { %p2599_p10 = scmp.lt.s32.totalorder %s2597_s12, %s2591_s6 }
 0x15c   : > { %p2600_p1 = por %p2599_p10, %p2598_p9 }
 0x15e   : > { %p2601_p2 = pnand %p2600_p1, %p2594_p6 }
 0x182   : > { %v376_v54 = vpop.permute.xlu0 %375 }
 0x186   : > { %v378_v10 = vpop.permute.xlu1 %377 }
 0x187   : > { %v380_v6 = vpop.permute.xlu0 %379  ;;  %v388_v51 = vsel %vm387_vm5, %v376_v54, %v378_v10 }
 0x188   : > { %v389_v43 = vsel %vm387_vm5, %v378_v10, %v380_v6  ;;  %v396_v55 = vmax.f32 %v3116_v11, %v388_v51 }
 0x189   : > { %v397_v7 = vmax.f32 %v3128_v27, %v389_v43 }
 0x18a   : > { %v382_v46 = vpop.permute.xlu1 %381 }
 0x18b   : > { %v384_v32 = vpop.permute.xlu0 %383 }
 0x18c   : > { %v390_v21 = vsel %vm387_vm5, %v382_v46, %v384_v32 }
 0x18d   : > { %v398_v57 = vmax.f32 %v3159_v42, %v390_v21 }
 0x18e   : > { %v386_v50 = vpop.permute.xlu1 %385 }
 0x18f   : > { %v495_v35 = vpop.permute.xlu0 %494  ;;  %v391_v30 = vsel %vm387_vm5, %v384_v32, %v386_v50 }
 0x190   : > { %v399_v3 = vmax.f32 %v3164_v29, %v391_v30 }
 0x196   : > { %v497_v22 = vpop.permute.xlu1 %496  ;;  %v499_v23 = vpop.permute.xlu0 %498 }
 0x197   : > { %v506_v61 = vsel %vm387_vm5, %v495_v35, %v497_v22  ;;  %v507_v0 = vsel %vm387_vm5, %v497_v22, %v499_v23 }
 0x198   : > { %v514_v62 = vadd.f32 %v506_v61, %v2917_v14  ;;  %v515_v59 = vadd.f32 %v507_v0, %v2928_v31  ;;  %v1678_v14 = vstv %s1672_s14 }
 0x19a   : > { %v501_v47 = vpop.permute.xlu1 %500  ;;  %v503_v41 = vpop.permute.xlu0 %502 }
 0x19b   : > { %v508_v56 = vsel %vm387_vm5, %v501_v47, %v503_v41  ;;  %v1027_v47 = vrot.slane %v1022_v39, %v1026_v28 }
 0x19c   : > { %v516_v20 = vadd.f32 %v508_v56, %v2960_v60  ;;  %v1030_v60 = vsub.s32 1, %v1025_v9 }
 0x19e   : > { %v505_v37 = vpop.permute.xlu1 %504  ;;  %v401_v53 = vpop.permute.xlu0 %400 }
 0x19f   : > { %v509_v63 = vsel %vm387_vm5, %v503_v41, %v505_v37  ;;  %v1035_v41 = vrot.slane %v1022_v39, %v1034_v25  ;;  %v1031_v37 = vrot.slane %v1022_v39, %v1030_v60 }
 0x1a0   : > { %v517_v19 = vadd.f32 %v509_v63, %v2966_v2  ;;  %v1038_v2 = vsub.s32 3, %v1025_v9 }
 0x1a2   : > { %v403_v52 = vpop.permute.xlu1 %402  ;;  %v405_v13 = vpop.permute.xlu0 %404 }
 0x1a3   : > { %v413_v49 = vsel %vm412_vm4, %v401_v53, %v403_v52  ;;  %v414_v11 = vsel %vm412_vm4, %v403_v52, %v405_v13  ;;  %v1039_v53 = vrot.slane %v1022_v39, %v1038_v2 }
 0x1a4   : > { %v421_v36 = vmax.f32 %v396_v55, %v413_v49  ;;  %v422_v12 = vmax.f32 %v397_v7, %v414_v11  ;;  %v1759_v55 = vstv %s3328_s10 }
 0x1a6   : > { %v407_v15 = vpop.permute.xlu1 %406  ;;  %v409_v48 = vpop.permute.xlu0 %408  ;;  %v1679_v38 = vmul.f32 %v1678_v14, %v421_v36  ;;  %v1680_v46 = vmul.f32 %v1678_v14, %v422_v12 }
 0x1a7   : > { %v415_v24 = vsel %vm412_vm4, %v407_v15, %v409_v48 }
 0x1a8   : > { %v423_v54 = vmax.f32 %v398_v57, %v415_v24 }
 0x1aa   : > { %v411_v16 = vpop.permute.xlu1 %410  ;;  %v519_v40 = vpop.permute.xlu0 %518  ;;  %v1681_v52 = vmul.f32 %v1678_v14, %v423_v54 }
 0x1ab   : > { %v416_v42 = vsel %vm412_vm4, %v409_v48, %v411_v16 }
 0x1ac   : > { %v424_v32 = vmax.f32 %v399_v3, %v416_v42 }
 0x1ae   : > { %v521_v45 = vpop.permute.xlu1 %520  ;;  %v523_v33 = vpop.permute.xlu0 %522  ;;  %v1682_v48 = vmul.f32 %v1678_v14, %v424_v32 }
 0x1af   : > { %v530_v26 = vsel %vm412_vm4, %v519_v40, %v521_v45  ;;  %v531_v27 = vsel %vm412_vm4, %v521_v45, %v523_v33 }
 0x1b0   : > { %v538_v8 = vadd.f32 %v530_v26, %v514_v62  ;;  %v539_v44 = vadd.f32 %v531_v27, %v515_v59 }
 0x1b2   : > { %v1684_v10 = vmul.f32 %v1683_v5, %v538_v8  ;;  %v1685_v50 = vmul.f32 %v1683_v5, %v539_v44 }
 0x1b4   : > { %v1688_v15 = vadd.f32 %v1684_v10, %v1679_v38  ;;  %v1689_v45 = vadd.f32 %v1685_v50, %v1680_v46 }
 0x1b7   : > { %v525_v34 = vpop.permute.xlu1 %524  ;;  %v527_v1 = vpop.permute.xlu0 %526 }
 0x1b8   : > { %v532_v18 = vsel %vm412_vm4, %v525_v34, %v527_v1 }
 0x1b9   : > { %v540_v6 = vadd.f32 %v532_v18, %v516_v20 }
 0x1bb   : > { %v529_v4 = vpop.permute.xlu1 %528  ;;  %v1727_v31 = vpop.permute.xlu0 %1726  ;;  %v1686_v13 = vmul.f32 %v1683_v5, %v540_v6 }
 0x1bc   : > { %v533_v29 = vsel %vm412_vm4, %v527_v1, %v529_v4 }
 0x1bd   : > { %v541_v35 = vadd.f32 %v533_v29, %v517_v19  ;;  %v1690_v62 = vadd.f32 %v1686_v13, %v1681_v52 }
 0x1bf   : > { %v1729_v58 = vpop.permute.xlu1 %1728  ;;  %v1731_v22 = vpop.permute.xlu0 %1730  ;;  %v1687_v16 = vmul.f32 %v1683_v5, %v541_v35 }
 0x1c0   : > { %v1738_v40 = vsel %vm387_vm5, %v1727_v31, %v1729_v58  ;;  %v1739_v51 = vsel %vm387_vm5, %v1729_v58, %v1731_v22 }
 0x1c1   : > { %v1746_v30 = vadd.f32 %v1738_v40, %v1688_v15  ;;  %v1747_v49 = vadd.f32 %v1739_v51, %v1689_v45  ;;  %v1691_v26 = vadd.f32 %v1687_v16, %v1682_v48 }
 0x1c3   : > { %v1733_v23 = vpop.permute.xlu1 %1732  ;;  %v1735_v4 = vpop.permute.xlu0 %1734 }
 0x1c4   : > { %v1740_v3 = vsel %vm387_vm5, %v1733_v23, %v1735_v4 }
 0x1c5   : > { %v1748_v60 = vadd.f32 %v1740_v3, %v1690_v62 }
 0x1c9   : > { %v1737_v59 = vpop.permute.xlu1 %1736 }
 0x1ca   : > { %v1741_v36 = vsel %vm387_vm5, %v1735_v4, %v1737_v59 }
 0x1cb   : > { %v1749_v54 = vadd.f32 %v1741_v36, %v1691_v26 }
 0x228   : > { %v1345_v33 = vpop.f32.mrb[0].mxu0  ;;  %v1653_v34 = vpop.f32.mrb[0].mxu1 }
 0x229   : > { %v2351_v43 = vadd.f32 %v1345_v33, %v1027_v47  ;;  %v2355_v61 = vadd.f32 %v1653_v34, %v1035_v41  ;;  %v1347_v0 = vpop.f32.mrb[1].mxu0  ;;  %v1655_v1 = vpop.f32.mrb[1].mxu1 }
 0x22a   : > { %v2352_v7 = vadd.f32 %v1347_v0, %v1031_v37  ;;  %v2356_v21 = vadd.f32 %v1655_v1, %v1039_v53 }
 0x22b   : > { %v1664_v56 = vmax.f32 %v2351_v43, 0.0  ;;  %v1666_v63 = vmax.f32 %v2355_v61, 0.0 }
 0x22c   : > { %v1665_v11 = vmax.f32 %v2352_v7, 0.0  ;;  %v1667_v27 = vmax.f32 %v2356_v21, 0.0  ;;  %v1351_v9 = vpop.f32.mrb[2].mxu0  ;;  %v1659_v57 = vpop.f32.mrb[2].mxu1 }
 0x22d   : > { %v1751_v14 = vmul.f32 %v1750_v17, %v1664_v56  ;;  %v2353_v5 = vadd.f32 %v1351_v9, %v1027_v47  ;;  %v2357_v31 = vadd.f32 %v1659_v57, %v1035_v41  ;;  %v1353_v20 = vpop.f32.mrb[3].mxu0  ;;  %v1661_v19 = vpop.f32.mrb[3].mxu1  ;;  %v1760_v44 = vmul.f32 %v1759_v55, %v1666_v63 }
 0x22e   : > { %v1752_v8 = vmul.f32 %v1750_v17, %v1665_v11  ;;  %v2354_v58 = vadd.f32 %v1353_v20, %v1031_v37  ;;  %v2358_v12 = vadd.f32 %v1661_v19, %v1039_v53  ;;  %v1761_v39 = vmul.f32 %v1759_v55, %v1667_v27 }
 0x22f   : > { %v1755_v24 = vadd.f32 %v1751_v14, %v1746_v30  ;;  %v1668_v18 = vmax.f32 %v2353_v5, 0.0  ;;  %v1670_v42 = vmax.f32 %v2357_v31, 0.0 }
 0x230   : > { %v1756_v29 = vadd.f32 %v1752_v8, %v1747_v49  ;;  %v1669_v28 = vmax.f32 %v2354_v58, 0.0  ;;  %v1671_v25 = vmax.f32 %v2358_v12, 0.0 }
 0x231   : > { %v1764_v2 = vadd.f32 %v1760_v44, %v1755_v24  ;;  %v1753_v38 = vmul.f32 %v1750_v17, %v1668_v18  ;;  %v1762_v32 = vmul.f32 %v1759_v55, %v1670_v42 }
 0x232   : > { %v1765_v10 = vadd.f32 %v1761_v39, %v1756_v29  ;;  %v1754_v6 = vmul.f32 %v1750_v17, %v1669_v28  ;;  %v1763_v35 = vmul.f32 %v1759_v55, %v1671_v25 }
 0x233   : > { %1768 = vst [vmem:[%s271_s30] sm:$0xff] %v1764_v2  ;;  %v1757_v46 = vadd.f32 %v1753_v38, %v1748_v60 }
 0x234   : > { %1769 = vst [vmem:[%s271_s30 + $0x8] sm:$0xff] %v1765_v10  ;;  %v1758_v50 = vadd.f32 %v1754_v6, %v1749_v54 }
 0x235   : > { %v1766_v22 = vadd.f32 %v1762_v32, %v1757_v46 }
 0x236   : > { %v1767_v23 = vadd.f32 %v1763_v35, %v1758_v50 }
 0x237   : > { %1770 = vst [vmem:[%s271_s30 + $0x10] sm:$0xff] %v1766_v22 }
 0x238   : > { %1771 = vst [vmem:[%s271_s30 + $0x18] sm:$0xff] %v1767_v23 }
 0x239   : > { %2604 = shalt.err (!%p2601_p2)
}
 0x23a   : > { %s2605_s13 = scalar_lea.hbm %s3343_s26, 512  ;;  %s2609_s27 = scalar_lea.hbm %s3395_s5, 1024 }
 0x23b   : > { %p2606_p0 = scmp.ne.s32.totalorder %s3343_s26, %s2605_s13  ;;  %p2610_p7 = scmp.lt.u32.totalorder %s3343_s26, %s3395_s5 }
 0x23c   : > { %p2611_p12 = scmp.lt.u32.totalorder %s2609_s27, %s2605_s13  ;;  %p2613_p11 = scmp.lt.u32.totalorder %s2605_s13, %s3343_s26 }
 0x23d   : > { %p2607_p3 = pnand %p2606_p0, %p3413_p13 }
 0x23e   : > { %p2612_p8 = por %p2611_p12, %p2610_p7 }
 0x23f   : > { %p2608_p4 = pneg %p2607_p3 }
 0x240   : > { %p2614_p5 = por %p2613_p11, %p2612_p8 }
 0x242   : > { %p2615_p6 = pnand %p2614_p5, %p2608_p4 }
 0x244   : > { %2618 = shalt.err (!%p2615_p6)
}
 0x245   : > { %s2681_s23 = smov 256   ;;  %s2682_s30 = smov 16  }
 0x246   : > { %2400 = dma.vmem_to_hbm [thread:$0]  (%p3413_p13), %s3345_s8, 512, %s3343_s26, %s3349_s22, %s2681_s23, %s2681_s23, %s2682_s30  }
 0x247 PF: > { %p2427_p9 = scmp.ge.s32.totalorder %s2665_s21, 2  ;;  %s1801_s16 = sand.u32 1, %s2653_s18  }
 0x248   : > { %p3414_p10 = scmp.ne.s32.totalorder %s3401_s29, 0  ;;  %s1802_s25 = scalar_lea.sflag [#allocation4], %s1801_s16 }
 0x24a   : > { %p2416_p1 = pnand %p2427_p9, %p3414_p10 }
 0x24c   : > { %2648 = dma.done.wait (!%p2416_p1), %s1802_s25, 512  }
 0x24d   : > { %2650 = vsyncadd (!%p2416_p1), %s1802_s25, 4294966784  ;;  %s3415_s7 = sld [smem:[#allocation15_spill]]  ;;  %p18_p2 = scmp.ge.s32.totalorder %s2738_s24, 4  }
 0x24e   : > { %s3416_s18 = smov %s2657_s19  ;;  %s3417_s19 = smov %s2661_s20 }
 0x24f   : > { %s3419_s21 = smov %s2738_s24  ;;  %20 = sbr.rel (!%p18_p2) target bundleno = 6 (0x6), region = 93 }
 0x253   : > { %s3418_s20 = smov %s3415_s7 }
 0x256   :  { %1807 = vsyncpa [#allocation3], 1 }
 0x257   :  { %1809 = vsyncpa [#allocation3 + $0x1], 1 }
 0x258   :  { %1810 = vsyncpa [#allocation8], 1 }
 0x259   :  { %1811 = vsyncpa [#allocation4], 1 }
 0x25a   :  { %1813 = vsyncpa [#allocation4 + $0x1], 1 }
 0x25b   :  { %1814 = vsyncpa [#allocation5], 1 }
 0x25c   :  { %1816 = vsyncpa [#allocation5 + $0x1], 1 }

</bundles_post_ra>
